<compile_context>
chip_gen: v6e
topology: v6e:2x2x1
jax: 0.10.0
libtpu: 0.0.40
codegen_flags: <defaults>
</compile_context>

<pallas_src>
import functools
import math

import jax
import jax.numpy as jnp
from jax.experimental import pallas as pl
from jax.experimental.pallas import tpu as pltpu


def _layernorm(x, g, b, eps=1e-5):
    mu = jnp.mean(x, axis=-1, keepdims=True)
    var = jnp.mean((x - mu) ** 2, axis=-1, keepdims=True)
    return (x - mu) * jax.lax.rsqrt(var + eps) * g + b


# ----------------------------------------------------------------------------
# Fused encoder-stack kernel.
#   grid = (n_parallel, num_layers):  p = sample chunk ("parallel"),
#                                     l = layer index   ("arbitrary")
#   x_scr (VMEM scratch) carries the activation across layers for chunk p.
#   packed small params (pe rows): 0=bq 1=bk 2=bv 3=bo 4=b2 5=ln1_g 6=ln1_b
#                                  7=ln2_g 8=ln2_b ;  ph row 0 = b1.
# ----------------------------------------------------------------------------
def encoder_stack_kernel(x_ref, wqkv_ref, wo_ref, w1_ref, w2_ref, pe_ref, ph_ref,
                         out_ref, x_scr, *, num_heads):
    l = pl.program_id(1)
    num_layers = pl.num_programs(1)

    Nc, S, E = x_scr.shape
    NS = Nc * S
    hd = E // num_heads
    scale = 1.0 / math.sqrt(hd)

    # Load the input block into the resident activation scratch at layer 0.
    @pl.when(l == 0)
    def _():
        x_scr[...] = x_ref[...].astype(jnp.float32)

    x2 = x_scr[...].reshape(NS, E)                 # [N*S, E] token-major
    pe = pe_ref[0]                                 # [9, E] packed per-layer vectors
    b1 = ph_ref[0]                                 # [1, H]

    # --- self attention -------------------------------------------------------
    # QKV projection over all tokens at once (weights pre-transposed: x @ W).
    qkv = jnp.dot(x2, wqkv_ref[0], preferred_element_type=jnp.float32)   # [N*S, 3E]
    q = (qkv[:, 0 * E:1 * E] + pe[0:1]).reshape(Nc, S, E)
    k = (qkv[:, 1 * E:2 * E] + pe[1:2]).reshape(Nc, S, E)
    v = (qkv[:, 2 * E:3 * E] + pe[2:3]).reshape(Nc, S, E)

    wo = wo_ref[0]                                 # [E, E] (already W_o.T)
    attn = None
    for h in range(num_heads):                     # few head groups; each op batched over Nc
        sl = slice(h * hd, (h + 1) * hd)
        qh, kh, vh = q[:, :, sl], k[:, :, sl], v[:, :, sl]
        s = jnp.einsum('nqd,nkd->nqk', qh, kh,
                       preferred_element_type=jnp.float32) * scale       # [Nc, S, S]
        s = s - jnp.max(s, axis=-1, keepdims=True)
        p_attn = jnp.exp(s)
        p_attn = p_attn * pl.reciprocal(jnp.sum(p_attn, axis=-1, keepdims=True),
                                        approx=True)
        oh = jnp.einsum('nqk,nkd->nqd', p_attn, vh,
                        preferred_element_type=jnp.float32)              # [Nc, S, hd]
        # fold head output straight into the output projection (no concat)
        term = jnp.dot(oh.reshape(NS, hd), wo[sl, :],
                       preferred_element_type=jnp.float32)               # [N*S, E]
        attn = term if attn is None else attn + term
    attn = attn + pe[3:4]

    y = _layernorm(x2 + attn, pe[5:6], pe[6:7])    # post-norm (norm1)

    # --- feed forward ---------------------------------------------------------
    ff = jnp.dot(y, w1_ref[0], preferred_element_type=jnp.float32) + b1
    ff = jnp.maximum(ff, 0.0)                      # ReLU
    ff = jnp.dot(ff, w2_ref[0], preferred_element_type=jnp.float32) + pe[4:5]

    z = _layernorm(y + ff, pe[7:8], pe[8:9])       # post-norm (norm2)
    x_scr[...] = z.reshape(Nc, S, E)

    # --- final mean-pool over the sequence, written once on the last layer -----
    @pl.when(l == num_layers - 1)
    def _():
        out_ref[0] = jnp.mean(z.reshape(Nc, S, E), axis=1).astype(out_ref.dtype)


# ----------------------------------------------------------------------------
# Wrapper: packs / pre-transposes PyTorch-layout weights (trace time, free) and
# launches the fused kernel once.
# ----------------------------------------------------------------------------
def transformer_text_encoder(embedded_text, layers, *, num_heads, n_parallel=2):
    B, D, M, W, E = embedded_text.shape
    N, S = B * D, M * W
    L = len(layers)
    H = layers[0]["linear1_weight"].shape[0]
    assert E % num_heads == 0

    if N % n_parallel != 0 or N < n_parallel:
        n_parallel = 1
    Nc = N // n_parallel

    x = embedded_text.reshape(N, S, E).astype(jnp.float32)

    # Stacked, pre-transposed weights: kernel computes x @ W (no in-kernel .T).
    wqkv = jnp.stack([p["in_proj_weight"].T for p in layers])        # [L, E, 3E]
    wo = jnp.stack([p["out_proj_weight"].T for p in layers])         # [L, E, E]
    w1 = jnp.stack([p["linear1_weight"].T for p in layers])          # [L, E, H]
    w2 = jnp.stack([p["linear2_weight"].T for p in layers])          # [L, H, E]
    # Packed small per-layer vectors.
    pe = jnp.stack([jnp.stack([
        p["in_proj_bias"][:E], p["in_proj_bias"][E:2 * E], p["in_proj_bias"][2 * E:],
        p["out_proj_bias"], p["linear2_bias"],
        p["norm1_weight"], p["norm1_bias"],
        p["norm2_weight"], p["norm2_bias"]]) for p in layers])       # [L, 9, E]
    ph = jnp.stack([p["linear1_bias"][None, :] for p in layers])     # [L, 1, H]

    out = pl.pallas_call(
        functools.partial(encoder_stack_kernel, num_heads=num_heads),
        out_shape=jax.ShapeDtypeStruct((n_parallel, Nc, E), jnp.float32),
        grid=(n_parallel, L),
        in_specs=[
            pl.BlockSpec((Nc, S, E), lambda p, l: (p, 0, 0)),        # activations
            pl.BlockSpec((1, E, 3 * E), lambda p, l: (l, 0, 0)),     # Wqkv^T
            pl.BlockSpec((1, E, E), lambda p, l: (l, 0, 0)),         # Wo^T
            pl.BlockSpec((1, E, H), lambda p, l: (l, 0, 0)),         # W1^T
            pl.BlockSpec((1, H, E), lambda p, l: (l, 0, 0)),         # W2^T
            pl.BlockSpec((1, 9, E), lambda p, l: (l, 0, 0)),         # packed E-wide vecs
            pl.BlockSpec((1, 1, H), lambda p, l: (l, 0, 0)),         # packed H-wide vecs
        ],
        out_specs=pl.BlockSpec((1, Nc, E), lambda p, l: (p, 0, 0)),
        scratch_shapes=[pltpu.VMEM((Nc, S, E), jnp.float32)],
        compiler_params=pltpu.CompilerParams(
            dimension_semantics=("parallel", "arbitrary")),
    )(x, wqkv, wo, w1, w2, pe, ph)

    return out.reshape(B, D, E)


# ----------------------------------------------------------------------------
# Pure-JAX reference (matches nn.TransformerEncoderLayer defaults, eval mode).
# ----------------------------------------------------------------------------
def _reference(embedded_text, layers, num_heads):
    B, D, M, W, E = embedded_text.shape
    N, S = B * D, M * W
    hd = E // num_heads
    x = embedded_text.reshape(N, S, E).astype(jnp.float32)

    def ln(t, g, b, eps=1e-5):
        mu = t.mean(-1, keepdims=True)
        var = ((t - mu) ** 2).mean(-1, keepdims=True)
        return (t - mu) * jax.lax.rsqrt(var + eps) * g + b

    for p in layers:
        qkv = x @ p["in_proj_weight"].T + p["in_proj_bias"]
        q, k, v = jnp.split(qkv, 3, axis=-1)

        def heads(t):
            return t.reshape(N, S, num_heads, hd).transpose(0, 2, 1, 3)

        qh, kh, vh = heads(q), heads(k), heads(v)
        s = jnp.einsum('nhqd,nhkd->nhqk', qh, kh) / math.sqrt(hd)
        a = jax.nn.softmax(s, axis=-1)
        o = jnp.einsum('nhqk,nhkd->nhqd', a, vh).transpose(0, 2, 1, 3).reshape(N, S, E)
        o = o @ p["out_proj_weight"].T + p["out_proj_bias"]
        y = ln(x + o, p["norm1_weight"], p["norm1_bias"])
        ff = jax.nn.relu(y @ p["linear1_weight"].T + p["linear1_bias"])
        ff = ff @ p["linear2_weight"].T + p["linear2_bias"]
        x = ln(y + ff, p["norm2_weight"], p["norm2_bias"])

    return x.reshape(B, D, S, E).mean(axis=2)


if __name__ == "__main__":
    # small shapes consistent with the module
    B, D, M, W = 2, 2, 2, 4            # batch, num_days, num_messages, num_words
    E, num_heads, num_layers, H = 32, 4, 2, 64   # d_model, nhead, layers, dim_feedforward

    key = jax.random.PRNGKey(0)
    keys = iter(jax.random.split(key, 16 * num_layers + 4))

    def nrm(shape, scale=0.05):
        return (jax.random.normal(next(keys), shape) * scale).astype(jnp.float32)

    layers = []
    for _ in range(num_layers):
        layers.append(dict(
            in_proj_weight=nrm((3 * E, E)),
            in_proj_bias=nrm((3 * E,)),
            out_proj_weight=nrm((E, E)),
            out_proj_bias=nrm((E,)),
            linear1_weight=nrm((H, E)),
            linear1_bias=nrm((H,)),
            linear2_weight=nrm((E, H)),
            linear2_bias=nrm((E,)),
            norm1_weight=jnp.ones((E,), jnp.float32),
            norm1_bias=jnp.zeros((E,), jnp.float32),
            norm2_weight=jnp.ones((E,), jnp.float32),
            norm2_bias=jnp.zeros((E,), jnp.float32),
        ))

    embedded_text = jax.random.normal(next(keys), (B, D, M, W, E), dtype=jnp.float32)

    out = transformer_text_encoder(embedded_text, layers, num_heads=num_heads)
    jax.block_until_ready(out)

    assert out.shape == (B, D, E) and out.dtype == jnp.float32
    assert bool(jnp.all(jnp.isfinite(out)))

    ref = _reference(embedded_text, layers, num_heads)
    max_err = float(jnp.max(jnp.abs(out - ref)))
    assert max_err < 1e-2, f"mismatch vs reference: {max_err}"

    print("KERNEL_OK")
</pallas_src>

<mosaic_0001>
module attributes {stable_mosaic.version = 11 : i64} {
  func.func @encoder_stack_kernel(%arg0: i32, %arg1: i32, %arg2: memref<2x8x32xf32, #tpu.memory_space<vmem>>, %arg3: memref<1x32x96xf32, #tpu.memory_space<vmem>>, %arg4: memref<1x32x32xf32, #tpu.memory_space<vmem>>, %arg5: memref<1x32x64xf32, #tpu.memory_space<vmem>>, %arg6: memref<1x64x32xf32, #tpu.memory_space<vmem>>, %arg7: memref<1x9x32xf32, #tpu.memory_space<vmem>>, %arg8: memref<1x1x64xf32, #tpu.memory_space<vmem>>, %arg9: memref<1x2x32xf32, #tpu.memory_space<vmem>>, %arg10: memref<2x8x32xf32, #tpu.memory_space<vmem>>) attributes {dimension_semantics = [#tpu.dimension_semantics<parallel>, #tpu.dimension_semantics<arbitrary>], iteration_bounds = array<i64: 2, 2>, scalar_prefetch = 0 : i64, scratch_operands = 1 : i64, tpu.core_type = #tpu.core_type<tc>, window_params = [{transform_indices = @transform_0, window_bounds = array<i64: 2, 8, 32>}, {transform_indices = @transform_1, window_bounds = array<i64: 1, 32, 96>}, {transform_indices = @transform_2, window_bounds = array<i64: 1, 32, 32>}, {transform_indices = @transform_3, window_bounds = array<i64: 1, 32, 64>}, {transform_indices = @transform_4, window_bounds = array<i64: 1, 64, 32>}, {transform_indices = @transform_5, window_bounds = array<i64: 1, 9, 32>}, {transform_indices = @transform_6, window_bounds = array<i64: 1, 1, 64>}, {transform_indices = @transform_7, window_bounds = array<i64: 1, 2, 32>}]} {
    %c0_i32 = arith.constant 0 : i32
    %0 = arith.cmpi eq, %arg1, %c0_i32 : i32
    %1 = arith.extui %0 : i1 to i32
    %c0_i32_0 = arith.constant 0 : i32
    %2 = arith.cmpi ne, %1, %c0_i32_0 : i32
    scf.if %2 {
      %c0_62 = arith.constant 0 : index
      %c0_63 = arith.constant 0 : index
      %c0_64 = arith.constant 0 : index
      %183 = vector.load %arg2[%c0_62, %c0_63, %c0_64] : memref<2x8x32xf32, #tpu.memory_space<vmem>>, vector<2x8x32xf32>
      %c0_65 = arith.constant 0 : index
      %c0_66 = arith.constant 0 : index
      %c0_67 = arith.constant 0 : index
      %184 = vector.load %arg10[%c0_65, %c0_66, %c0_67] : memref<2x8x32xf32, #tpu.memory_space<vmem>>, vector<2x8x32xf32>
      tpu.vector_store %arg10[%c0_65, %c0_66, %c0_67], %183 {strides = array<i32>} : memref<2x8x32xf32, #tpu.memory_space<vmem>>, vector<2x8x32xf32>,
    } else {
    }
    %c0 = arith.constant 0 : index
    %c0_1 = arith.constant 0 : index
    %c0_2 = arith.constant 0 : index
    %3 = vector.load %arg10[%c0, %c0_1, %c0_2] : memref<2x8x32xf32, #tpu.memory_space<vmem>>, vector<2x8x32xf32>
    %4 = vector.shape_cast %3 : vector<2x8x32xf32> to vector<16x32xf32>
    %c0_3 = arith.constant 0 : index
    %c0_4 = arith.constant 0 : index
    %c0_5 = arith.constant 0 : index
    %5 = vector.load %arg7[%c0_3, %c0_4, %c0_5] : memref<1x9x32xf32, #tpu.memory_space<vmem>>, vector<1x9x32xf32>
    %6 = vector.shape_cast %5 : vector<1x9x32xf32> to vector<9x32xf32>
    %c0_6 = arith.constant 0 : index
    %c0_7 = arith.constant 0 : index
    %c0_8 = arith.constant 0 : index
    %7 = vector.load %arg8[%c0_6, %c0_7, %c0_8] : memref<1x1x64xf32, #tpu.memory_space<vmem>>, vector<1x1x64xf32>
    %8 = vector.shape_cast %7 : vector<1x1x64xf32> to vector<1x64xf32>
    %c0_9 = arith.constant 0 : index
    %c0_10 = arith.constant 0 : index
    %c0_11 = arith.constant 0 : index
    %9 = vector.load %arg3[%c0_9, %c0_10, %c0_11] : memref<1x32x96xf32, #tpu.memory_space<vmem>>, vector<1x32x96xf32>
    %10 = vector.shape_cast %9 : vector<1x32x96xf32> to vector<32x96xf32>
    %cst = arith.constant dense<0.000000e+00> : vector<16x96xf32>
    %11 = tpu.matmul %4, %10, %cst {dimension_numbers = #tpu.dot_dimension_numbers<[1], [0], [0], [1], [0, 0, 1, 1], [], []>} : vector<16x32xf32>, vector<32x96xf32>, vector<16x96xf32> -> vector<16x96xf32>
    %12 = vector.extract_strided_slice %11 {offsets = [0, 0], sizes = [16, 32], strides = [1, 1]} : vector<16x96xf32> to vector<16x32xf32>
    %13 = vector.extract_strided_slice %6 {offsets = [0, 0], sizes = [1, 32], strides = [1, 1]} : vector<9x32xf32> to vector<1x32xf32>
    %14 = vector.broadcast %13 : vector<1x32xf32> to vector<16x32xf32>
    %15 = arith.addf %12, %14 : vector<16x32xf32>
    %16 = vector.shape_cast %15 : vector<16x32xf32> to vector<2x8x32xf32>
    %17 = vector.extract_strided_slice %11 {offsets = [0, 32], sizes = [16, 32], strides = [1, 1]} : vector<16x96xf32> to vector<16x32xf32>
    %18 = vector.extract_strided_slice %6 {offsets = [1, 0], sizes = [1, 32], strides = [1, 1]} : vector<9x32xf32> to vector<1x32xf32>
    %19 = vector.broadcast %18 : vector<1x32xf32> to vector<16x32xf32>
    %20 = arith.addf %17, %19 : vector<16x32xf32>
    %21 = vector.shape_cast %20 : vector<16x32xf32> to vector<2x8x32xf32>
    %22 = vector.extract_strided_slice %11 {offsets = [0, 64], sizes = [16, 32], strides = [1, 1]} : vector<16x96xf32> to vector<16x32xf32>
    %23 = vector.extract_strided_slice %6 {offsets = [2, 0], sizes = [1, 32], strides = [1, 1]} : vector<9x32xf32> to vector<1x32xf32>
    %24 = vector.broadcast %23 : vector<1x32xf32> to vector<16x32xf32>
    %25 = arith.addf %22, %24 : vector<16x32xf32>
    %26 = vector.shape_cast %25 : vector<16x32xf32> to vector<2x8x32xf32>
    %c0_12 = arith.constant 0 : index
    %c0_13 = arith.constant 0 : index
    %c0_14 = arith.constant 0 : index
    %27 = vector.load %arg4[%c0_12, %c0_13, %c0_14] : memref<1x32x32xf32, #tpu.memory_space<vmem>>, vector<1x32x32xf32>
    %28 = vector.shape_cast %27 : vector<1x32x32xf32> to vector<32x32xf32>
    %29 = vector.extract_strided_slice %16 {offsets = [0, 0, 0], sizes = [2, 8, 8], strides = [1, 1, 1]} : vector<2x8x32xf32> to vector<2x8x8xf32>
    %30 = vector.extract_strided_slice %21 {offsets = [0, 0, 0], sizes = [2, 8, 8], strides = [1, 1, 1]} : vector<2x8x32xf32> to vector<2x8x8xf32>
    %31 = vector.extract_strided_slice %26 {offsets = [0, 0, 0], sizes = [2, 8, 8], strides = [1, 1, 1]} : vector<2x8x32xf32> to vector<2x8x8xf32>
    "tpu.trace_start"() <{level = 10 : i32, message = "nqd,nkd->nqk"}> : () -> ()
    %cst_15 = arith.constant dense<0.000000e+00> : vector<2x8x8xf32>
    %32 = tpu.matmul %29, %30, %cst_15 {dimension_numbers = #tpu.dot_dimension_numbers<[2], [2], [1], [1], [0, 0, 0, 1, 1, 1], [0], [0]>} : vector<2x8x8xf32>, vector<2x8x8xf32>, vector<2x8x8xf32> -> vector<2x8x8xf32>
    "tpu.trace_stop"() : () -> ()
    %cst_16 = arith.constant 0.353553385 : f32
    %33 = vector.broadcast %cst_16 : f32 to vector<2x8x8xf32>
    %34 = arith.mulf %32, %33 : vector<2x8x8xf32>
    %cst_17 = arith.constant dense<0xFF800000> : vector<2x8xf32>
    %35 = vector.multi_reduction <maximumf>, %34, %cst_17 [2] : vector<2x8x8xf32> to vector<2x8xf32>
    %36 = vector.shape_cast %35 : vector<2x8xf32> to vector<2x8x1xf32>
    %37 = vector.broadcast %36 : vector<2x8x1xf32> to vector<2x8x8xf32>
    %38 = arith.subf %34, %37 : vector<2x8x8xf32>
    %39 = math.exp %38 : vector<2x8x8xf32>
    %cst_18 = arith.constant dense<0.000000e+00> : vector<2x8xf32>
    %40 = vector.multi_reduction <add>, %39, %cst_18 [2] : vector<2x8x8xf32> to vector<2x8xf32>
    %41 = vector.shape_cast %40 : vector<2x8xf32> to vector<2x8x1xf32>
    %42 = tpu.reciprocal %41 {approx = true} : vector<2x8x1xf32> -> vector<2x8x1xf32>
    %43 = vector.broadcast %42 : vector<2x8x1xf32> to vector<2x8x8xf32>
    %44 = arith.mulf %39, %43 : vector<2x8x8xf32>
    "tpu.trace_start"() <{level = 10 : i32, message = "nqk,nkd->nqd"}> : () -> ()
    %cst_19 = arith.constant dense<0.000000e+00> : vector<2x8x8xf32>
    %45 = tpu.matmul %44, %31, %cst_19 {dimension_numbers = #tpu.dot_dimension_numbers<[2], [1], [1], [2], [0, 0, 0, 1, 1, 2], [0], [0]>} : vector<2x8x8xf32>, vector<2x8x8xf32>, vector<2x8x8xf32> -> vector<2x8x8xf32>
    "tpu.trace_stop"() : () -> ()
    %46 = vector.shape_cast %45 : vector<2x8x8xf32> to vector<16x8xf32>
    %47 = vector.extract_strided_slice %28 {offsets = [0, 0], sizes = [8, 32], strides = [1, 1]} : vector<32x32xf32> to vector<8x32xf32>
    %cst_20 = arith.constant dense<0.000000e+00> : vector<16x32xf32>
    %48 = tpu.matmul %46, %47, %cst_20 {dimension_numbers = #tpu.dot_dimension_numbers<[1], [0], [0], [1], [0, 0, 1, 1], [], []>} : vector<16x8xf32>, vector<8x32xf32>, vector<16x32xf32> -> vector<16x32xf32>
    %49 = vector.extract_strided_slice %16 {offsets = [0, 0, 8], sizes = [2, 8, 8], strides = [1, 1, 1]} : vector<2x8x32xf32> to vector<2x8x8xf32>
    %50 = vector.extract_strided_slice %21 {offsets = [0, 0, 8], sizes = [2, 8, 8], strides = [1, 1, 1]} : vector<2x8x32xf32> to vector<2x8x8xf32>
    %51 = vector.extract_strided_slice %26 {offsets = [0, 0, 8], sizes = [2, 8, 8], strides = [1, 1, 1]} : vector<2x8x32xf32> to vector<2x8x8xf32>
    "tpu.trace_start"() <{level = 10 : i32, message = "nqd,nkd->nqk"}> : () -> ()
    %cst_21 = arith.constant dense<0.000000e+00> : vector<2x8x8xf32>
    %52 = tpu.matmul %49, %50, %cst_21 {dimension_numbers = #tpu.dot_dimension_numbers<[2], [2], [1], [1], [0, 0, 0, 1, 1, 1], [0], [0]>} : vector<2x8x8xf32>, vector<2x8x8xf32>, vector<2x8x8xf32> -> vector<2x8x8xf32>
    "tpu.trace_stop"() : () -> ()
    %cst_22 = arith.constant 0.353553385 : f32
    %53 = vector.broadcast %cst_22 : f32 to vector<2x8x8xf32>
    %54 = arith.mulf %52, %53 : vector<2x8x8xf32>
    %cst_23 = arith.constant dense<0xFF800000> : vector<2x8xf32>
    %55 = vector.multi_reduction <maximumf>, %54, %cst_23 [2] : vector<2x8x8xf32> to vector<2x8xf32>
    %56 = vector.shape_cast %55 : vector<2x8xf32> to vector<2x8x1xf32>
    %57 = vector.broadcast %56 : vector<2x8x1xf32> to vector<2x8x8xf32>
    %58 = arith.subf %54, %57 : vector<2x8x8xf32>
    %59 = math.exp %58 : vector<2x8x8xf32>
    %cst_24 = arith.constant dense<0.000000e+00> : vector<2x8xf32>
    %60 = vector.multi_reduction <add>, %59, %cst_24 [2] : vector<2x8x8xf32> to vector<2x8xf32>
    %61 = vector.shape_cast %60 : vector<2x8xf32> to vector<2x8x1xf32>
    %62 = tpu.reciprocal %61 {approx = true} : vector<2x8x1xf32> -> vector<2x8x1xf32>
    %63 = vector.broadcast %62 : vector<2x8x1xf32> to vector<2x8x8xf32>
    %64 = arith.mulf %59, %63 : vector<2x8x8xf32>
    "tpu.trace_start"() <{level = 10 : i32, message = "nqk,nkd->nqd"}> : () -> ()
    %cst_25 = arith.constant dense<0.000000e+00> : vector<2x8x8xf32>
    %65 = tpu.matmul %64, %51, %cst_25 {dimension_numbers = #tpu.dot_dimension_numbers<[2], [1], [1], [2], [0, 0, 0, 1, 1, 2], [0], [0]>} : vector<2x8x8xf32>, vector<2x8x8xf32>, vector<2x8x8xf32> -> vector<2x8x8xf32>
    "tpu.trace_stop"() : () -> ()
    %66 = vector.shape_cast %65 : vector<2x8x8xf32> to vector<16x8xf32>
    %67 = vector.extract_strided_slice %28 {offsets = [8, 0], sizes = [8, 32], strides = [1, 1]} : vector<32x32xf32> to vector<8x32xf32>
    %cst_26 = arith.constant dense<0.000000e+00> : vector<16x32xf32>
    %68 = tpu.matmul %66, %67, %cst_26 {dimension_numbers = #tpu.dot_dimension_numbers<[1], [0], [0], [1], [0, 0, 1, 1], [], []>} : vector<16x8xf32>, vector<8x32xf32>, vector<16x32xf32> -> vector<16x32xf32>
    %69 = arith.addf %48, %68 : vector<16x32xf32>
    %70 = vector.extract_strided_slice %16 {offsets = [0, 0, 16], sizes = [2, 8, 8], strides = [1, 1, 1]} : vector<2x8x32xf32> to vector<2x8x8xf32>
    %71 = vector.extract_strided_slice %21 {offsets = [0, 0, 16], sizes = [2, 8, 8], strides = [1, 1, 1]} : vector<2x8x32xf32> to vector<2x8x8xf32>
    %72 = vector.extract_strided_slice %26 {offsets = [0, 0, 16], sizes = [2, 8, 8], strides = [1, 1, 1]} : vector<2x8x32xf32> to vector<2x8x8xf32>
    "tpu.trace_start"() <{level = 10 : i32, message = "nqd,nkd->nqk"}> : () -> ()
    %cst_27 = arith.constant dense<0.000000e+00> : vector<2x8x8xf32>
    %73 = tpu.matmul %70, %71, %cst_27 {dimension_numbers = #tpu.dot_dimension_numbers<[2], [2], [1], [1], [0, 0, 0, 1, 1, 1], [0], [0]>} : vector<2x8x8xf32>, vector<2x8x8xf32>, vector<2x8x8xf32> -> vector<2x8x8xf32>
    "tpu.trace_stop"() : () -> ()
    %cst_28 = arith.constant 0.353553385 : f32
    %74 = vector.broadcast %cst_28 : f32 to vector<2x8x8xf32>
    %75 = arith.mulf %73, %74 : vector<2x8x8xf32>
    %cst_29 = arith.constant dense<0xFF800000> : vector<2x8xf32>
    %76 = vector.multi_reduction <maximumf>, %75, %cst_29 [2] : vector<2x8x8xf32> to vector<2x8xf32>
    %77 = vector.shape_cast %76 : vector<2x8xf32> to vector<2x8x1xf32>
    %78 = vector.broadcast %77 : vector<2x8x1xf32> to vector<2x8x8xf32>
    %79 = arith.subf %75, %78 : vector<2x8x8xf32>
    %80 = math.exp %79 : vector<2x8x8xf32>
    %cst_30 = arith.constant dense<0.000000e+00> : vector<2x8xf32>
    %81 = vector.multi_reduction <add>, %80, %cst_30 [2] : vector<2x8x8xf32> to vector<2x8xf32>
    %82 = vector.shape_cast %81 : vector<2x8xf32> to vector<2x8x1xf32>
    %83 = tpu.reciprocal %82 {approx = true} : vector<2x8x1xf32> -> vector<2x8x1xf32>
    %84 = vector.broadcast %83 : vector<2x8x1xf32> to vector<2x8x8xf32>
    %85 = arith.mulf %80, %84 : vector<2x8x8xf32>
    "tpu.trace_start"() <{level = 10 : i32, message = "nqk,nkd->nqd"}> : () -> ()
    %cst_31 = arith.constant dense<0.000000e+00> : vector<2x8x8xf32>
    %86 = tpu.matmul %85, %72, %cst_31 {dimension_numbers = #tpu.dot_dimension_numbers<[2], [1], [1], [2], [0, 0, 0, 1, 1, 2], [0], [0]>} : vector<2x8x8xf32>, vector<2x8x8xf32>, vector<2x8x8xf32> -> vector<2x8x8xf32>
    "tpu.trace_stop"() : () -> ()
    %87 = vector.shape_cast %86 : vector<2x8x8xf32> to vector<16x8xf32>
    %88 = vector.extract_strided_slice %28 {offsets = [16, 0], sizes = [8, 32], strides = [1, 1]} : vector<32x32xf32> to vector<8x32xf32>
    %cst_32 = arith.constant dense<0.000000e+00> : vector<16x32xf32>
    %89 = tpu.matmul %87, %88, %cst_32 {dimension_numbers = #tpu.dot_dimension_numbers<[1], [0], [0], [1], [0, 0, 1, 1], [], []>} : vector<16x8xf32>, vector<8x32xf32>, vector<16x32xf32> -> vector<16x32xf32>
    %90 = arith.addf %69, %89 : vector<16x32xf32>
    %91 = vector.extract_strided_slice %16 {offsets = [0, 0, 24], sizes = [2, 8, 8], strides = [1, 1, 1]} : vector<2x8x32xf32> to vector<2x8x8xf32>
    %92 = vector.extract_strided_slice %21 {offsets = [0, 0, 24], sizes = [2, 8, 8], strides = [1, 1, 1]} : vector<2x8x32xf32> to vector<2x8x8xf32>
    %93 = vector.extract_strided_slice %26 {offsets = [0, 0, 24], sizes = [2, 8, 8], strides = [1, 1, 1]} : vector<2x8x32xf32> to vector<2x8x8xf32>
    "tpu.trace_start"() <{level = 10 : i32, message = "nqd,nkd->nqk"}> : () -> ()
    %cst_33 = arith.constant dense<0.000000e+00> : vector<2x8x8xf32>
    %94 = tpu.matmul %91, %92, %cst_33 {dimension_numbers = #tpu.dot_dimension_numbers<[2], [2], [1], [1], [0, 0, 0, 1, 1, 1], [0], [0]>} : vector<2x8x8xf32>, vector<2x8x8xf32>, vector<2x8x8xf32> -> vector<2x8x8xf32>
    "tpu.trace_stop"() : () -> ()
    %cst_34 = arith.constant 0.353553385 : f32
    %95 = vector.broadcast %cst_34 : f32 to vector<2x8x8xf32>
    %96 = arith.mulf %94, %95 : vector<2x8x8xf32>
    %cst_35 = arith.constant dense<0xFF800000> : vector<2x8xf32>
    %97 = vector.multi_reduction <maximumf>, %96, %cst_35 [2] : vector<2x8x8xf32> to vector<2x8xf32>
    %98 = vector.shape_cast %97 : vector<2x8xf32> to vector<2x8x1xf32>
    %99 = vector.broadcast %98 : vector<2x8x1xf32> to vector<2x8x8xf32>
    %100 = arith.subf %96, %99 : vector<2x8x8xf32>
    %101 = math.exp %100 : vector<2x8x8xf32>
    %cst_36 = arith.constant dense<0.000000e+00> : vector<2x8xf32>
    %102 = vector.multi_reduction <add>, %101, %cst_36 [2] : vector<2x8x8xf32> to vector<2x8xf32>
    %103 = vector.shape_cast %102 : vector<2x8xf32> to vector<2x8x1xf32>
    %104 = tpu.reciprocal %103 {approx = true} : vector<2x8x1xf32> -> vector<2x8x1xf32>
    %105 = vector.broadcast %104 : vector<2x8x1xf32> to vector<2x8x8xf32>
    %106 = arith.mulf %101, %105 : vector<2x8x8xf32>
    "tpu.trace_start"() <{level = 10 : i32, message = "nqk,nkd->nqd"}> : () -> ()
    %cst_37 = arith.constant dense<0.000000e+00> : vector<2x8x8xf32>
    %107 = tpu.matmul %106, %93, %cst_37 {dimension_numbers = #tpu.dot_dimension_numbers<[2], [1], [1], [2], [0, 0, 0, 1, 1, 2], [0], [0]>} : vector<2x8x8xf32>, vector<2x8x8xf32>, vector<2x8x8xf32> -> vector<2x8x8xf32>
    "tpu.trace_stop"() : () -> ()
    %108 = vector.shape_cast %107 : vector<2x8x8xf32> to vector<16x8xf32>
    %109 = vector.extract_strided_slice %28 {offsets = [24, 0], sizes = [8, 32], strides = [1, 1]} : vector<32x32xf32> to vector<8x32xf32>
    %cst_38 = arith.constant dense<0.000000e+00> : vector<16x32xf32>
    %110 = tpu.matmul %108, %109, %cst_38 {dimension_numbers = #tpu.dot_dimension_numbers<[1], [0], [0], [1], [0, 0, 1, 1], [], []>} : vector<16x8xf32>, vector<8x32xf32>, vector<16x32xf32> -> vector<16x32xf32>
    %111 = arith.addf %90, %110 : vector<16x32xf32>
    %112 = vector.extract_strided_slice %6 {offsets = [3, 0], sizes = [1, 32], strides = [1, 1]} : vector<9x32xf32> to vector<1x32xf32>
    %113 = vector.broadcast %112 : vector<1x32xf32> to vector<16x32xf32>
    %114 = arith.addf %111, %113 : vector<16x32xf32>
    %115 = arith.addf %4, %114 : vector<16x32xf32>
    %116 = vector.extract_strided_slice %6 {offsets = [5, 0], sizes = [1, 32], strides = [1, 1]} : vector<9x32xf32> to vector<1x32xf32>
    %117 = vector.extract_strided_slice %6 {offsets = [6, 0], sizes = [1, 32], strides = [1, 1]} : vector<9x32xf32> to vector<1x32xf32>
    %cst_39 = arith.constant dense<0.000000e+00> : vector<16xf32>
    %118 = vector.multi_reduction <add>, %115, %cst_39 [1] : vector<16x32xf32> to vector<16xf32>
    %119 = vector.shape_cast %118 : vector<16xf32> to vector<16x1xf32>
    %cst_40 = arith.constant 3.200000e+01 : f32
    %120 = vector.broadcast %cst_40 : f32 to vector<16x1xf32>
    %121 = arith.divf %119, %120 : vector<16x1xf32>
    %122 = vector.broadcast %121 : vector<16x1xf32> to vector<16x32xf32>
    %123 = arith.subf %115, %122 : vector<16x32xf32>
    %124 = arith.mulf %123, %123 : vector<16x32xf32>
    %cst_41 = arith.constant dense<0.000000e+00> : vector<16xf32>
    %125 = vector.multi_reduction <add>, %124, %cst_41 [1] : vector<16x32xf32> to vector<16xf32>
    %126 = vector.shape_cast %125 : vector<16xf32> to vector<16x1xf32>
    %cst_42 = arith.constant 3.200000e+01 : f32
    %127 = vector.broadcast %cst_42 : f32 to vector<16x1xf32>
    %128 = arith.divf %126, %127 : vector<16x1xf32>
    %129 = vector.broadcast %121 : vector<16x1xf32> to vector<16x32xf32>
    %130 = arith.subf %115, %129 : vector<16x32xf32>
    %cst_43 = arith.constant 9.99999974E-6 : f32
    %131 = vector.broadcast %cst_43 : f32 to vector<16x1xf32>
    %132 = arith.addf %128, %131 : vector<16x1xf32>
    %133 = math.rsqrt %132 : vector<16x1xf32>
    %134 = vector.broadcast %133 : vector<16x1xf32> to vector<16x32xf32>
    %135 = arith.mulf %130, %134 : vector<16x32xf32>
    %136 = vector.broadcast %116 : vector<1x32xf32> to vector<16x32xf32>
    %137 = arith.mulf %135, %136 : vector<16x32xf32>
    %138 = vector.broadcast %117 : vector<1x32xf32> to vector<16x32xf32>
    %139 = arith.addf %137, %138 : vector<16x32xf32>
    %c0_44 = arith.constant 0 : index
    %c0_45 = arith.constant 0 : index
    %c0_46 = arith.constant 0 : index
    %140 = vector.load %arg5[%c0_44, %c0_45, %c0_46] : memref<1x32x64xf32, #tpu.memory_space<vmem>>, vector<1x32x64xf32>
    %141 = vector.shape_cast %140 : vector<1x32x64xf32> to vector<32x64xf32>
    %cst_47 = arith.constant dense<0.000000e+00> : vector<16x64xf32>
    %142 = tpu.matmul %139, %141, %cst_47 {dimension_numbers = #tpu.dot_dimension_numbers<[1], [0], [0], [1], [0, 0, 1, 1], [], []>} : vector<16x32xf32>, vector<32x64xf32>, vector<16x64xf32> -> vector<16x64xf32>
    %143 = vector.broadcast %8 : vector<1x64xf32> to vector<16x64xf32>
    %144 = arith.addf %142, %143 : vector<16x64xf32>
    %cst_48 = arith.constant 0.000000e+00 : f32
    %145 = vector.broadcast %cst_48 : f32 to vector<16x64xf32>
    %146 = arith.maximumf %144, %145 : vector<16x64xf32>
    %c0_49 = arith.constant 0 : index
    %c0_50 = arith.constant 0 : index
    %c0_51 = arith.constant 0 : index
    %147 = vector.load %arg6[%c0_49, %c0_50, %c0_51] : memref<1x64x32xf32, #tpu.memory_space<vmem>>, vector<1x64x32xf32>
    %148 = vector.shape_cast %147 : vector<1x64x32xf32> to vector<64x32xf32>
    %cst_52 = arith.constant dense<0.000000e+00> : vector<16x32xf32>
    %149 = tpu.matmul %146, %148, %cst_52 {dimension_numbers = #tpu.dot_dimension_numbers<[1], [0], [0], [1], [0, 0, 1, 1], [], []>} : vector<16x64xf32>, vector<64x32xf32>, vector<16x32xf32> -> vector<16x32xf32>
    %150 = vector.extract_strided_slice %6 {offsets = [4, 0], sizes = [1, 32], strides = [1, 1]} : vector<9x32xf32> to vector<1x32xf32>
    %151 = vector.broadcast %150 : vector<1x32xf32> to vector<16x32xf32>
    %152 = arith.addf %149, %151 : vector<16x32xf32>
    %153 = arith.addf %139, %152 : vector<16x32xf32>
    %154 = vector.extract_strided_slice %6 {offsets = [7, 0], sizes = [1, 32], strides = [1, 1]} : vector<9x32xf32> to vector<1x32xf32>
    %155 = vector.extract_strided_slice %6 {offsets = [8, 0], sizes = [1, 32], strides = [1, 1]} : vector<9x32xf32> to vector<1x32xf32>
    %cst_53 = arith.constant dense<0.000000e+00> : vector<16xf32>
    %156 = vector.multi_reduction <add>, %153, %cst_53 [1] : vector<16x32xf32> to vector<16xf32>
    %157 = vector.shape_cast %156 : vector<16xf32> to vector<16x1xf32>
    %cst_54 = arith.constant 3.200000e+01 : f32
    %158 = vector.broadcast %cst_54 : f32 to vector<16x1xf32>
    %159 = arith.divf %157, %158 : vector<16x1xf32>
    %160 = vector.broadcast %159 : vector<16x1xf32> to vector<16x32xf32>
    %161 = arith.subf %153, %160 : vector<16x32xf32>
    %162 = arith.mulf %161, %161 : vector<16x32xf32>
    %cst_55 = arith.constant dense<0.000000e+00> : vector<16xf32>
    %163 = vector.multi_reduction <add>, %162, %cst_55 [1] : vector<16x32xf32> to vector<16xf32>
    %164 = vector.shape_cast %163 : vector<16xf32> to vector<16x1xf32>
    %cst_56 = arith.constant 3.200000e+01 : f32
    %165 = vector.broadcast %cst_56 : f32 to vector<16x1xf32>
    %166 = arith.divf %164, %165 : vector<16x1xf32>
    %167 = vector.broadcast %159 : vector<16x1xf32> to vector<16x32xf32>
    %168 = arith.subf %153, %167 : vector<16x32xf32>
    %cst_57 = arith.constant 9.99999974E-6 : f32
    %169 = vector.broadcast %cst_57 : f32 to vector<16x1xf32>
    %170 = arith.addf %166, %169 : vector<16x1xf32>
    %171 = math.rsqrt %170 : vector<16x1xf32>
    %172 = vector.broadcast %171 : vector<16x1xf32> to vector<16x32xf32>
    %173 = arith.mulf %168, %172 : vector<16x32xf32>
    %174 = vector.broadcast %154 : vector<1x32xf32> to vector<16x32xf32>
    %175 = arith.mulf %173, %174 : vector<16x32xf32>
    %176 = vector.broadcast %155 : vector<1x32xf32> to vector<16x32xf32>
    %177 = arith.addf %175, %176 : vector<16x32xf32>
    %178 = vector.shape_cast %177 : vector<16x32xf32> to vector<2x8x32xf32>
    %c0_58 = arith.constant 0 : index
    %c0_59 = arith.constant 0 : index
    %c0_60 = arith.constant 0 : index
    %179 = vector.load %arg10[%c0_58, %c0_59, %c0_60] : memref<2x8x32xf32, #tpu.memory_space<vmem>>, vector<2x8x32xf32>
    tpu.vector_store %arg10[%c0_58, %c0_59, %c0_60], %178 {strides = array<i32>} : memref<2x8x32xf32, #tpu.memory_space<vmem>>, vector<2x8x32xf32>,
    %c1_i32 = arith.constant 1 : i32
    %180 = arith.cmpi eq, %arg1, %c1_i32 : i32
    %181 = arith.extui %180 : i1 to i32
    %c0_i32_61 = arith.constant 0 : i32
    %182 = arith.cmpi ne, %181, %c0_i32_61 : i32
    scf.if %182 {
      %183 = vector.shape_cast %177 : vector<16x32xf32> to vector<2x8x32xf32>
      %cst_62 = arith.constant dense<0.000000e+00> : vector<2x32xf32>
      %184 = vector.multi_reduction <add>, %183, %cst_62 [1] : vector<2x8x32xf32> to vector<2x32xf32>
      %cst_63 = arith.constant 8.000000e+00 : f32
      %185 = vector.broadcast %cst_63 : f32 to vector<2x32xf32>
      %186 = arith.divf %184, %185 : vector<2x32xf32>
      %c0_64 = arith.constant 0 : index
      %c0_65 = arith.constant 0 : index
      %c0_66 = arith.constant 0 : index
      %187 = vector.load %arg9[%c0_64, %c0_65, %c0_66] : memref<1x2x32xf32, #tpu.memory_space<vmem>>, vector<1x2x32xf32>
      %188 = vector.shape_cast %187 : vector<1x2x32xf32> to vector<2x32xf32>
      %189 = vector.shape_cast %186 : vector<2x32xf32> to vector<1x2x32xf32>
      tpu.vector_store %arg9[%c0_64, %c0_65, %c0_66], %189 {strides = array<i32>} : memref<1x2x32xf32, #tpu.memory_space<vmem>>, vector<1x2x32xf32>,
    } else {
    }
    return
  }
  func.func @transform_0(%arg0: i32, %arg1: i32) -> (i32, i32, i32) {
    %c0_i32 = arith.constant 0 : i32
    %c0_i32_0 = arith.constant 0 : i32
    %c0_i32_1 = arith.constant 0 : i32
    return %arg0, %c0_i32, %c0_i32_0 : i32, i32, i32
  }
  func.func @transform_1(%arg0: i32, %arg1: i32) -> (i32, i32, i32) {
    %c0_i32 = arith.constant 0 : i32
    %c0_i32_0 = arith.constant 0 : i32
    %c0_i32_1 = arith.constant 0 : i32
    return %arg1, %c0_i32, %c0_i32_0 : i32, i32, i32
  }
  func.func @transform_2(%arg0: i32, %arg1: i32) -> (i32, i32, i32) {
    %c0_i32 = arith.constant 0 : i32
    %c0_i32_0 = arith.constant 0 : i32
    %c0_i32_1 = arith.constant 0 : i32
    return %arg1, %c0_i32, %c0_i32_0 : i32, i32, i32
  }
  func.func @transform_3(%arg0: i32, %arg1: i32) -> (i32, i32, i32) {
    %c0_i32 = arith.constant 0 : i32
    %c0_i32_0 = arith.constant 0 : i32
    %c0_i32_1 = arith.constant 0 : i32
    return %arg1, %c0_i32, %c0_i32_0 : i32, i32, i32
  }
  func.func @transform_4(%arg0: i32, %arg1: i32) -> (i32, i32, i32) {
    %c0_i32 = arith.constant 0 : i32
    %c0_i32_0 = arith.constant 0 : i32
    %c0_i32_1 = arith.constant 0 : i32
    return %arg1, %c0_i32, %c0_i32_0 : i32, i32, i32
  }
  func.func @transform_5(%arg0: i32, %arg1: i32) -> (i32, i32, i32) {
    %c0_i32 = arith.constant 0 : i32
    %c0_i32_0 = arith.constant 0 : i32
    %c0_i32_1 = arith.constant 0 : i32
    return %arg1, %c0_i32, %c0_i32_0 : i32, i32, i32
  }
  func.func @transform_6(%arg0: i32, %arg1: i32) -> (i32, i32, i32) {
    %c0_i32 = arith.constant 0 : i32
    %c0_i32_0 = arith.constant 0 : i32
    %c0_i32_1 = arith.constant 0 : i32
    return %arg1, %c0_i32, %c0_i32_0 : i32, i32, i32
  }
  func.func @transform_7(%arg0: i32, %arg1: i32) -> (i32, i32, i32) {
    %c0_i32 = arith.constant 0 : i32
    %c0_i32_0 = arith.constant 0 : i32
    %c0_i32_1 = arith.constant 0 : i32
    return %arg0, %c0_i32, %c0_i32_0 : i32, i32, i32
  }
}

</mosaic_0001>

<bundles_post_ra>
// kernel: tpu_custom_call.1
= control target key start
LH: loop header
LB: loop body
LE: loop exit
PB: predicated region body
PF: predicated region fallthrough
CT: control target
= control target key end

     0   :  { %s3577_s0 = inlined_call_operand.vmem [shape: f32[4,8,32], index: 0, kind: input, shape index: {}]   ;;  %s3578_s1 = inlined_call_operand.vmem [shape: f32[2,32,96], index: 1, kind: input, shape index: {}]   ;;  %s3579_s2 = inlined_call_operand.vmem [shape: f32[2,32,32], index: 2, kind: input, shape index: {}]   ;;  %s3580_s3 = inlined_call_operand.vmem [shape: f32[2,32,64], index: 3, kind: input, shape index: {}]   ;;  %s3581_s4 = inlined_call_operand.vmem [shape: f32[2,64,32], index: 4, kind: input, shape index: {}]   ;;  %s3582_s5 = inlined_call_operand.vmem [shape: f32[2,9,32], index: 5, kind: input, shape index: {}]   ;;  %s3583_s6 = inlined_call_operand.vmem [shape: f32[2,1,64], index: 6, kind: input, shape index: {}]   ;;  %s3584_s7 = inlined_call_operand.hbm [shape: f32[2,2,32], index: 7, kind: output, shape index: {}]  }
   0x1   :  { %3594 = sst [smem:[#allocation15_spill]] %s3577_s0 }
   0x2   :  { %3595 = sst [smem:[#allocation16_spill]] %s3578_s1 }
   0x3   :  { %12 = vsyncpa [#allocation4], 0 }
   0x4   :  { %14 = vsyncpa [#allocation4 + $0x1], 0  ;;  %s3201_s24 = smov 0   ;;  %s3203_s25 = smov 0  }
   0x5   :  { %s3205_s26 = smov 0   ;;  %s3207_s27 = smov 0  }
   0x6   :  { %s3209_s28 = smov 0   ;;  %s3211_s29 = smov 0  }
   0x7   :  { %s3213_s30 = smov 0   ;;  %s3215_s8 = smov 0  }
   0x8 LB: > { %3596 = sst [smem:[#allocation6_spill]] %s3116_s24  ;;  %s2651_s9 = sadd.s32 4294967295, %s3144_s8   ;;  %s3144_s8 = sphi %s3215_s8, %s20_s8   ;;  %s3140_s30 = sphi %s3213_s30, %s3618_s30   ;;  %s3136_s29 = sphi %s3211_s29, %s3617_s29   ;;  %s3132_s28 = sphi %s3209_s28, %s3616_s28   ;;  %s3128_s27 = sphi %s3207_s27, %s3615_s27   ;;  %s3124_s26 = sphi %s3205_s26, %s3614_s26   ;;  %s3120_s25 = sphi %s3203_s25, %s3620_s25   ;;  %s3116_s24 = sphi %s3201_s24, %s3619_s24  }
   0x9   : > { %3597 = sst [smem:[#allocation7_spill]] %s3124_s26  ;;  %s2652_s10 = sadd.s32 4294967294, %s3144_s8  }
   0xa   : > { %3598 = sst [smem:[#allocation8_spill]] %s3136_s29  ;;  %s29_s11 = sadd.s32 1, %s3136_s29 }
   0xb   : > { %3599 = sst [smem:[#allocation9_spill]] %s3140_s30  ;;  %p30_p0 = scmp.ge.s32.totalorder %s29_s11, 2 }
   0xc   : > { %3600 = sst [smem:[#allocation10_spill]] %s3144_s8  ;;  %s32_s12 = sadd.s32 1, %s3140_s30 }
   0xd   : > { %p231_p1 = scmp.ne.s32.totalorder %s3124_s26, %s3120_s25  ;;  %p232_p2 = scmp.eq.s32.totalorder %s2651_s9, 3 }
   0xe   : > { %s3622_s11 = smov (%p30_p0, %s29_s11), 0  ;;  %s3624_s12 = smov (!%p30_p0, %s32_s12), %s3140_s30 }
   0xf   : > { %3601 = sst [smem:[#allocation11_spill]] %s3622_s11  ;;  %p3250_p3 = por %p232_p2, %p231_p1 }
  0x10   : > { %p237_p4 = scmp.ne.s32.totalorder %s3120_s25, %s3116_s24  ;;  %p34_p5 = scmp.ge.s32.totalorder %s3624_s12, 2 }
  0x11   : > { %p238_p6 = scmp.eq.s32.totalorder %s2652_s10, 3  ;;  %p2655_p7 = scmp.ge.s32.totalorder %s3144_s8, 1 }
  0x12   : > { %p311_p8 = scmp.lt.s32.totalorder %s3144_s8, 5  ;;  %s3626_s12 = smov (%p34_p5, %s3624_s12), 0 }
  0x13   : > { %3603 = sst [smem:[#allocation12_spill]] %s3626_s12  ;;  %p3260_p9 = por %p238_p6, %p237_p4 }
  0x14   : > { %p312_p10 = pnand %p2655_p7, %p311_p8  ;;  %s218_s15 = ssub.s32 %s3140_s30, %s3626_s12 }
  0x15   : > { %s3604_s14 = scalar_select %p3260_p9, 1, 0 }
  0x16   : > { %s221_s16 = sadd.s32 1, %s3124_s26  ;;  %p219_p11 = scmp.eq.s32.totalorder %s218_s15, 0 }
  0x17   : > { %3605 = sst [smem:[#allocation13_spill]] %s3604_s14  ;;  %315 = sbr.rel (%p312_p10) target bundleno = 4277 (0x10b5), region = 48 }
  0x18   : > { %s3268_s17 = scalar_select %p219_p11, %s3124_s26, %s221_s16  }
  0x19   : > { %s3586_s18 = sand.u32 (!%p312_p10), 1, %s3120_s25   ;;  %s2657_s19 = sshll.u32 (!%p312_p10), %s3132_s28, 1 }
  0x1a   : > { %3606 = sst [smem:[#allocation14_spill]] %s3268_s17  ;;  %s3274_s20 = sshll.u32 (!%p312_p10), %s3586_s18, 1 }
  0x1b   : > { %p372_p12 = scmp.lt.s32.totalorder (!%p312_p10), %s2657_s19, 3  ;;  %p377_p13 = scmp.lt.s32.totalorder (!%p312_p10), %s3128_s27, 1 }
  0x1c   : > { %s3607_s0 = sld [smem:[#allocation15_spill]]  ;;  %p2669_p0 = scmp.ne.s32.totalorder %s3128_s27, 0 }
  0x1d   : > { %s3628_s19 = smov (!%p372_p12, %s2657_s19), 3  ;;  %s3608_s1 = sld [smem:[#allocation16_spill]] }
  0x1e   : > { %s3278_s21 = scalar_select %p377_p13, %s3128_s27, 1 }
  0x1f   : > { %s2658_s22 = sshll.u32 %s3628_s19, 3 }
  0x20   : > { %s2715_s15 = sshll.u32 %s3278_s21, 5  ;;  %s2718_s19 = sshll.u32 %s3278_s21, 6 }
  0x21   : > { %s3290_s29 = scalar_lea.vmem %s3579_s2, %s2715_s15  ;;  %s3295_s14 = scalar_lea.vmem %s3580_s3, %s2715_s15 }
  0x22   : > { %s375_s10 = scalar_lea.vmem %s3607_s0, %s2658_s22  ;;  %s3301_s22 = scalar_lea.vmem %s3581_s4, %s2718_s19 }
  0x23   : > { %s381_s18 = scalar_lea.vmem %s3608_s1, %s2715_s15  ;;  %s2719_s23 = sshll.u32 %s3278_s21, 4 }
  0x24   : > { %s3307_s16 = scalar_lea.vmem %s3582_s5, %s2719_s23  ;;  %s404_s0 = scalar_lea.vmem %s3583_s6, %s3278_s21 }
  0x25   : > { %s370_s1 = scalar_lea.vmem [#allocation3], %s3274_s20  ;;  %408 = sbr.rel (%p2669_p0) target bundleno = 44 (0x2c), region = 52 }
  0x2a   : > { %v409_v0 = vld [vmem:[%s375_s10] sm:$0xff]  ;;  %vm411_vm0 = vcmask 261120   ;;  %v410_v1 = vld [vmem:[%s375_s10 + $0x8] sm:$0xff] }
  0x2b   : > { %412 = vst.msk [vmem:[#allocation2] sm:$0xff] %vm411_vm0, %v409_v0  ;;  %413 = vst.msk [vmem:[#allocation2 + $0x8] sm:$0xff] %vm411_vm0, %v410_v1 }
  0x2c PF: > { %v422_v2 = vld [vmem:[%s381_s18 + $0x18] sm:$0xff]  ;;  %v421_v3 = vld [vmem:[%s381_s18 + $0x10] sm:$0xff]  ;;  %vm423_vm1 = vcmask 261120   ;;  %v505_v4 = vlaneseq  ;;  %v420_v6 = vld [vmem:[%s381_s18 + $0x8] sm:$0xff]  ;;  %s3146_s24 = smov 32   ;;  %v3147_v13 = vmov 0.0  }
  0x2d   : > { %2786 = vmatprep.subr.mxu0 %v422_v2  ;;  %v3322_v8 = vld [vmem:[%s3307_s16] sm:$0xff]  ;;  %2802 = vmatprep.subr.mxu1 %v3147_v13  ;;  %vm3148_vm2 = vmmov 0   ;;  %s3149_s26 = smov 96   ;;  %vm538_vm3 = vcmask 64512   ;;  %s3150_s8 = smov 64   ;;  %vm2346_vm4 = vcmask 523264  }
  0x2e   : > { %2787 = vmatpush3.msra.mxu0 %v422_v2  ;;  %v3319_v7 = vshrl.u32 %v505_v4, 7  ;;  %v419_v9 = vld [vmem:[%s381_s18] sm:$0xff]  ;;  %2804 = vmatprep.mubr.msk.f32.mxu1 %vm3148_vm2, %v3147_v13  ;;  %s3151_s17 = smov 88   ;;  %s3152_s18 = smov 120  }
  0x2f   : > { %2788 = vmatprep.subr.mxu0 %v421_v3  ;;  %s3153_s10 = smov 56   ;;  %s3154_s15 = smov 80  }
  0x30   : > { %2789 = vmatpush3.msra.mxu0 %v421_v3  ;;  %v513_v10 = vsub.s32 1, %v3319_v7  ;;  %v507_v19 = vsub.s32 0, %v3319_v7  ;;  %v523_v33 = vsub.s32 2, %v3319_v7  ;;  %s3155_s19 = smov 112   ;;  %s3156_s23 = smov 48  }
  0x31   : > { %2790 = vmatprep.subr.mxu0 %v420_v6  ;;  %s3157_s9 = smov 72   ;;  %s3158_s12 = smov 104  }
  0x32   : > { %v3315_v5 = vld [vmem:[#allocation2] sm:$0xff]  ;;  %2791 = vmatpush3.msra.mxu0 %v420_v6  ;;  %v3325_v11 = vld [vmem:[#allocation2 + $0x8] sm:$0xff]  ;;  %v514_v12 = vrot.slane %v3322_v8, %v513_v10  ;;  %v508_v20 = vrot.slane %v3322_v8, %v507_v19  ;;  %v524_v34 = vrot.slane %v3322_v8, %v523_v33  ;;  %s3159_s30 = smov 40   ;;  %p2710_p1 = scmp.ne.s32.totalorder %s3128_s27, 1 }
  0x33   : > { %2794 = vmatprep.mubr.msk.f32.mxu0 %vm423_vm1, %v3315_v5  ;;  %2792 = vmatprep.subr.mxu0 %v419_v9 }
  0x34   : > { %2793 = vmatpush3.msra.mxu0 %v419_v9  ;;  %516 = vrot.lane.b32.xlu0 %v514_v12, %s3146_s24 }
  0x35   : > { %2795 = vmatmul.mubr.msk.f32.vlgmr.msra.gmra.mxu0 %vm423_vm1, %v3325_v11  ;;  %2797 = vmatprep.subr.mxu0 %v3147_v13 }
  0x36   : > { %2799 = vmatprep.mubr.msk.f32.mxu0 %vm3148_vm2, %v3147_v13 }
  0xa6   : > { %v517_v14 = vpop.permute.xlu0 %516 }
  0xf5   : > { %v2796_v15 = vpop.f32.mrf.mxu0 }
  0xf6   : > { %v3336_v16 = vadd.f32 %v2796_v15, %v517_v14  ;;  %v3345_v22 = vadd.f32 %v2796_v15, %v508_v20 }
  0xf7   : > { %v496_v17 = vpop.f32.mrf.mxu0 }
  0xf8   : > { %v3338_v18 = vadd.f32 %v517_v14, %v496_v17  ;;  %615 = vrot.lane.b32.xlu1 %v3336_v16, %s3149_s26  ;;  %v3349_v24 = vadd.f32 %v508_v20, %v496_v17 }
  0xfa   : > { %536 = vrot.lane.b32.xlu0 %v3338_v18, %s3149_s26 }
 0x16a   : > { %v616_v21 = vpop.permute.xlu1 %615 }
 0x16b   : > { %2803 = vmatpush3.xpose.msk.msra.mxu1 %vm538_vm3, %v616_v21 }
 0x16c   : > { %v537_v23 = vpop.permute.xlu0 %536  ;;  %2812 = vmatprep.subr.mxu1 %v3147_v13 }
 0x16d   : > { %2798 = vmatpush3.xpose.msk.msra.mxu0 %vm538_vm3, %v537_v23 }
 0x16e   : > { %2805 = vmatmul.mubr.msk.f32.vlgmr.msra.gmra.mxu1 %vm538_vm3, %v3345_v22  ;;  %2807 = vmatprep.subr.mxu0 %v3147_v13 }
 0x16f   : > { %2814 = vmatprep.mubr.msk.f32.mxu1 %vm3148_vm2, %v3147_v13 }
 0x170   : > { %2800 = vmatmul.mubr.msk.f32.vlgmr.msra.gmra.mxu0 %vm538_vm3, %v3349_v24 }
 0x171   : > { %2809 = vmatprep.mubr.msk.f32.mxu0 %vm3148_vm2, %v3147_v13 }
 0x22e   : > { %v688_v25 = vpop.f32.mrf.mxu1 }
 0x22f   : > { %v693_v26 = vmul.f32 0.35355338, %v688_v25 }
 0x230   : > { %v610_v27 = vpop.f32.mrf.mxu0  ;;  %v2806_v28 = vpop.f32.mrf.mxu1 }
 0x231   : > { %v692_v29 = vmul.f32 0.35355338, %v610_v27  ;;  %v697_v30 = vsel %vm538_vm3, %v693_v26, -inf }
 0x232   : > { %698 = vmax.xlane.f32.xlu0 %v697_v30  ;;  %v2801_v31 = vpop.f32.mrf.mxu0  ;;  %v531_v30 = vld [vmem:[%s3290_s29] sm:$0xff] }
 0x233   : > { %v694_v32 = vsel %vm538_vm3, %v692_v29, -inf }
 0x234   : > { %695 = vmax.xlane.f32.xlu1 %v694_v32 }
 0x248   : > { %526 = vrot.lane.b32.xlu0 %v524_v34, %s3150_s8 }
 0x2bb   : > { %v699_v35 = vpop.xlane.xlu0 %698 }
 0x2bc   : > { %v701_v39 = vsub.f32 %v693_v26, %v699_v35 }
 0x2bd   : > { %v696_v40 = vpop.xlane.xlu1 %695 }
 0x2be   : > { %v704_v41 = vmul.f32 1.442695, %v701_v39  ;;  %v700_v42 = vsub.f32 %v692_v29, %v696_v40 }
 0x2bf   : > { %v527_v36 = vpop.permute.xlu0 %526 }
 0x2c0   : > { %v3364_v37 = vadd.f32 %v527_v36, %v496_v17  ;;  %v3366_v38 = vadd.f32 %v2796_v15, %v527_v36  ;;  %3012 = vpow2.f32 %v704_v41  ;;  %v702_v43 = vmul.f32 1.442695, %v700_v42  ;;  %v532_v41 = vld [vmem:[%s3290_s29 + $0x8] sm:$0xff] }
 0x2c2   : > { %794 = vrot.lane.b32.xlu0 %v3366_v38, %s3150_s8  ;;  %717 = vrot.lane.b32.xlu1 %v3364_v37, %s3150_s8  ;;  %3014 = vpow2.f32 %v702_v43 }
 0x2c6   : > { %872 = vrot.lane.b32.xlu0 %v3338_v18, %s3151_s17  ;;  %950 = vrot.lane.b32.xlu1 %v3336_v16, %s3151_s17 }
 0x2ca   : > { %870 = vrot.lane.b32.xlu0 %v3349_v24, %s3152_s18 }
 0x2cd   : > { %v3013_v44 = vpop.eup %3012 }
 0x2ce   : > { %v709_v45 = vsel %vm538_vm3, %v3013_v44, 0.0 }
 0x2cf   : > { %v3015_v46 = vpop.eup %3014 }
 0x2d0   : > { %v706_v47 = vsel %vm538_vm3, %v3015_v46, 0.0 }
 0x2ea   : > { %710 = vadd.xlane.f32.xlu1 %v709_v45 }
 0x2ee   : > { %707 = vadd.xlane.f32.xlu1 %v706_v47 }
 0x2ff   : > { %948 = vrot.lane.b32.xlu1 %v3345_v22, %s3152_s18 }
 0x334   : > { %v795_v48 = vpop.permute.xlu0 %794  ;;  %v718_v49 = vpop.permute.xlu1 %717 }
 0x335   : > { %2808 = vmatpush3.msra.mxu0 %v718_v49  ;;  %2813 = vmatpush3.msra.mxu1 %v795_v48 }
 0x336   : > { %2822 = vmatprep.subr.mxu1 %v3147_v13  ;;  %2817 = vmatprep.subr.mxu0 %v3147_v13 }
 0x338   : > { %v951_v50 = vpop.permute.xlu1 %950  ;;  %v873_v56 = vpop.permute.xlu0 %872 }
 0x33c   : > { %v871_v59 = vpop.permute.xlu0 %870 }
 0x373   : > { %v711_v51 = vpop.xlane.xlu1 %710 }
 0x374   : > { %3016 = vrcp.f32 %v711_v51 }
 0x377   : > { %v708_v52 = vpop.xlane.xlu1 %707 }
 0x378   : > { %3018 = vrcp.f32 %v708_v52 }
 0x37b   : > { %v949_v58 = vpop.permute.xlu1 %948 }
 0x381   : > { %v3017_v53 = vpop.eup %3016 }
 0x382   : > { %v715_v54 = vmul.f32 %v3017_v53, %v3013_v44 }
 0x384   : > { %2815 = vmatmul.mubr.msk.f32.vlgmr.msra.gmra.mxu1 %vm538_vm3, %v715_v54 }
 0x385   : > { %v3019_v55 = vpop.eup %3018  ;;  %2823 = vmatpush3.xpose.msk.msra.mxu1 %vm538_vm3, %v951_v50  ;;  %2824 = vmatprep.mubr.msk.f32.mxu1 %vm3148_vm2, %v3147_v13 }
 0x386   : > { %v714_v57 = vmul.f32 %v3019_v55, %v3015_v46  ;;  %2832 = vmatprep.subr.mxu1 %v3147_v13 }
 0x388   : > { %2810 = vmatmul.mubr.msk.f32.vlgmr.msra.gmra.mxu0 %vm538_vm3, %v714_v57  ;;  %2825 = vmatmul.mubr.msk.f32.vlgmr.msra.gmra.mxu1 %vm538_vm3, %v949_v58 }
 0x389   : > { %2818 = vmatpush3.xpose.msk.msra.mxu0 %vm538_vm3, %v873_v56  ;;  %2819 = vmatprep.mubr.msk.f32.mxu0 %vm3148_vm2, %v3147_v13 }
 0x38a   : > { %2827 = vmatprep.subr.mxu0 %v3147_v13  ;;  %2834 = vmatprep.mubr.msk.f32.mxu1 %vm3148_vm2, %v3147_v13 }
 0x38c   : > { %2820 = vmatmul.mubr.msk.f32.vlgmr.msra.gmra.mxu0 %vm538_vm3, %v871_v59 }
 0x38d   : > { %2829 = vmatprep.mubr.msk.f32.mxu0 %vm3148_vm2, %v3147_v13 }
 0x444   : > { %v866_v60 = vpop.f32.mrf.mxu1 }
 0x446   : > { %v2816_v61 = vpop.f32.mrf.mxu1 }
 0x448   : > { %v789_v62 = vpop.f32.mrf.mxu0  ;;  %v1022_v63 = vpop.f32.mrf.mxu1 }
 0x449   : > { %v1027_v0 = vmul.f32 0.35355338, %v1022_v63 }
 0x44a   : > { %v2811_v1 = vpop.f32.mrf.mxu0  ;;  %v2826_v2 = vpop.f32.mrf.mxu1 }
 0x44b   : > { %v1031_v3 = vsel %vm538_vm3, %v1027_v0, -inf }
 0x44c   : > { %1032 = vmax.xlane.f32.xlu1 %v1031_v3  ;;  %v944_v4 = vpop.f32.mrf.mxu0 }
 0x44d   : > { %v1026_v6 = vmul.f32 0.35355338, %v944_v4 }
 0x44e   : > { %v2821_v9 = vpop.f32.mrf.mxu0 }
 0x44f   : > { %v1028_v10 = vsel %vm538_vm3, %v1026_v6, -inf }
 0x450   : > { %1029 = vmax.xlane.f32.xlu0 %v1028_v10 }
 0x45d   : > { %1050 = vrot.lane.b32.xlu1 %v3364_v37, %s3153_s10 }
 0x461   : > { %1366 = vrot.lane.b32.xlu1 %v3338_v18, %s3154_s15 }
 0x465   : > { %1444 = vrot.lane.b32.xlu1 %v3336_v16, %s3154_s15 }
 0x469   : > { %1442 = vrot.lane.b32.xlu1 %v3345_v22, %s3155_s19 }
 0x4d5   : > { %v1033_v12 = vpop.xlane.xlu1 %1032 }
 0x4d6   : > { %v1035_v14 = vsub.f32 %v1027_v0, %v1033_v12 }
 0x4d8   : > { %v1038_v15 = vmul.f32 1.442695, %v1035_v14 }
 0x4d9   : > { %v1051_v17 = vpop.permute.xlu1 %1050  ;;  %v1030_v19 = vpop.xlane.xlu0 %1029 }
 0x4da   : > { %3020 = vpow2.f32 %v1038_v15  ;;  %v1034_v20 = vsub.f32 %v1026_v6, %v1030_v19  ;;  %2828 = vmatpush3.msra.mxu0 %v1051_v17  ;;  %v533_v17 = vld [vmem:[%s3290_s29 + $0x10] sm:$0xff] }
 0x4db   : > { %2837 = vmatprep.subr.mxu0 %v532_v41 }
 0x4dc   : > { %v1036_v21 = vmul.f32 1.442695, %v1034_v20 }
 0x4dd   : > { %v1367_v32 = vpop.permute.xlu1 %1366 }
 0x4de   : > { %3022 = vpow2.f32 %v1036_v21 }
 0x4e1   : > { %v1445_v36 = vpop.permute.xlu1 %1444 }
 0x4e5   : > { %v1443_v40 = vpop.permute.xlu1 %1442 }
 0x4e7   : > { %v3021_v23 = vpop.eup %3020 }
 0x4e8   : > { %v1043_v25 = vsel %vm538_vm3, %v3021_v23, 0.0 }
 0x4e9   : > { %1044 = vadd.xlane.f32.xlu0 %v1043_v25 }
 0x4eb   : > { %v3023_v26 = vpop.eup %3022 }
 0x4ec   : > { %v1040_v27 = vsel %vm538_vm3, %v3023_v26, 0.0 }
 0x4ed   : > { %1041 = vadd.xlane.f32.xlu0 %v1040_v27 }
 0x503   : > { %1126 = vrot.lane.b32.xlu0 %v3366_v38, %s3153_s10 }
 0x507   : > { %1364 = vrot.lane.b32.xlu0 %v3349_v24, %s3155_s19 }
 0x572   : > { %v1045_v28 = vpop.xlane.xlu0 %1044 }
 0x573   : > { %3024 = vrcp.f32 %v1045_v28 }
 0x576   : > { %v1042_v29 = vpop.xlane.xlu0 %1041 }
 0x577   : > { %3026 = vrcp.f32 %v1042_v29 }
 0x57a   : > { %v1127_v31 = vpop.permute.xlu0 %1126 }
 0x57b   : > { %2833 = vmatpush3.msra.mxu1 %v1127_v31 }
 0x57c   : > { %2842 = vmatprep.subr.mxu1 %v531_v30 }
 0x57e   : > { %v1365_v49 = vpop.permute.xlu0 %1364 }
 0x580   : > { %v3025_v33 = vpop.eup %3024 }
 0x581   : > { %v1049_v34 = vmul.f32 %v3025_v33, %v3021_v23 }
 0x583   : > { %2835 = vmatmul.mubr.msk.f32.vlgmr.msra.gmra.mxu1 %vm538_vm3, %v1049_v34 }
 0x584   : > { %v3027_v35 = vpop.eup %3026  ;;  %2844 = vmatprep.mubr.msk.f32.mxu1 %vm538_vm3, %v789_v62  ;;  %2843 = vmatpush3.msra.mxu1 %v531_v30 }
 0x585   : > { %2852 = vmatprep.subr.mxu1 %v3147_v13  ;;  %v1048_v39 = vmul.f32 %v3027_v35, %v3023_v26 }
 0x587   : > { %2830 = vmatmul.mubr.msk.f32.vlgmr.msra.gmra.mxu0 %vm538_vm3, %v1048_v39  ;;  %2845 = vmatmul.mubr.msk.f32.vlgmr.msra.gmra.mxu1 %vm538_vm3, %v866_v60 }
 0x588   : > { %2853 = vmatpush3.xpose.msk.msra.mxu1 %vm538_vm3, %v1445_v36  ;;  %2854 = vmatprep.mubr.msk.f32.mxu1 %vm3148_vm2, %v3147_v13 }
 0x589   : > { %2862 = vmatprep.subr.mxu1 %v3147_v13  ;;  %2838 = vmatpush3.msra.mxu0 %v532_v41 }
 0x58a   : > { %2847 = vmatprep.subr.mxu0 %v3147_v13 }
 0x58b   : > { %2855 = vmatmul.mubr.msk.f32.vlgmr.msra.gmra.mxu1 %vm538_vm3, %v1443_v40 }
 0x58c   : > { %2864 = vmatprep.mubr.msk.f32.mxu1 %vm3148_vm2, %v3147_v13 }
 0x643   : > { %v1198_v42 = vpop.f32.mrf.mxu1 }
 0x645   : > { %v2836_v43 = vpop.f32.mrf.mxu1 }
 0x647   : > { %v1122_v44 = vpop.f32.mrf.mxu0  ;;  %v3419_v45 = vpop.f32.mrf.mxu1 }
 0x648   : > { %2839 = vmatprep.mubr.msk.f32.mxu0 %vm538_vm3, %v1122_v44 }
 0x649   : > { %v2831_v46 = vpop.f32.mrf.mxu0  ;;  %2840 = vmatmul.mubr.msk.f32.vlgmr.msra.gmra.mxu0 %vm538_vm3, %v1198_v42  ;;  %v3423_v47 = vpop.f32.mrf.mxu1 }
 0x64a   : > { %2848 = vmatpush3.xpose.msk.msra.mxu0 %vm538_vm3, %v1367_v32  ;;  %2849 = vmatprep.mubr.msk.f32.mxu0 %vm3148_vm2, %v3147_v13 }
 0x64b   : > { %v1516_v48 = vpop.f32.mrf.mxu1  ;;  %2857 = vmatprep.subr.mxu0 %v3147_v13 }
 0x64c   : > { %v1521_v50 = vmul.f32 0.35355338, %v1516_v48 }
 0x64d   : > { %2850 = vmatmul.mubr.msk.f32.vlgmr.msra.gmra.mxu0 %vm538_vm3, %v1365_v49  ;;  %v2856_v51 = vpop.f32.mrf.mxu1 }
 0x64e   : > { %v1525_v52 = vsel %vm538_vm3, %v1521_v50, -inf  ;;  %2859 = vmatprep.mubr.msk.f32.mxu0 %vm3148_vm2, %v3147_v13 }
 0x64f   : > { %1526 = vmax.xlane.f32.xlu1 %v1525_v52 }
 0x660   : > { %1544 = vrot.lane.b32.xlu1 %v3364_v37, %s3156_s23 }
 0x664   : > { %1781 = vrot.lane.b32.xlu1 %v3338_v18, %s3157_s9 }
 0x668   : > { %1859 = vrot.lane.b32.xlu1 %v3336_v16, %s3157_s9 }
 0x66c   : > { %1857 = vrot.lane.b32.xlu1 %v3345_v22, %s3158_s12 }
 0x6d8   : > { %v1527_v53 = vpop.xlane.xlu1 %1526 }
 0x6d9   : > { %v1529_v55 = vsub.f32 %v1521_v50, %v1527_v53 }
 0x6db   : > { %v1532_v56 = vmul.f32 1.442695, %v1529_v55 }
 0x6dc   : > { %v1545_v54 = vpop.permute.xlu1 %1544 }
 0x6dd   : > { %2858 = vmatpush3.msra.mxu0 %v1545_v54  ;;  %3028 = vpow2.f32 %v1532_v56 }
 0x6de   : > { %2867 = vmatprep.subr.mxu0 %v533_v17 }
 0x6e0   : > { %v1782_v12 = vpop.permute.xlu1 %1781 }
 0x6e4   : > { %v1860_v27 = vpop.permute.xlu1 %1859 }
 0x6e8   : > { %v1858_v30 = vpop.permute.xlu1 %1857 }
 0x6ea   : > { %v3029_v62 = vpop.eup %3028 }
 0x6eb   : > { %v1537_v16 = vsel %vm538_vm3, %v3029_v62, 0.0 }
 0x709   : > { %v3437_v57 = vpop.f32.mrf.mxu0 }
 0x70a   : > { %v1361_v36 = vadd.f32 %v3419_v45, %v3437_v57 }
 0x70b   : > { %v3439_v58 = vpop.f32.mrf.mxu0 }
 0x70c   : > { %v1356_v40 = vadd.f32 %v3423_v47, %v3439_v58 }
 0x70d   : > { %v1438_v59 = vpop.f32.mrf.mxu0 }
 0x70e   : > { %v1520_v60 = vmul.f32 0.35355338, %v1438_v59 }
 0x70f   : > { %v2851_v61 = vpop.f32.mrf.mxu0 }
 0x710   : > { %v1522_v18 = vsel %vm538_vm3, %v1520_v60, -inf }
 0x711   : > { %1523 = vmax.xlane.f32.xlu0 %v1522_v18 }
 0x715   : > { %1538 = vadd.xlane.f32.xlu0 %v1537_v16 }
 0x79a   : > { %v1524_v22 = vpop.xlane.xlu0 %1523 }
 0x79b   : > { %v1528_v63 = vsub.f32 %v1520_v60, %v1524_v22 }
 0x79d   : > { %v1530_v0 = vmul.f32 1.442695, %v1528_v63 }
 0x79e   : > { %v1539_v3 = vpop.xlane.xlu0 %1538 }
 0x79f   : > { %3030 = vpow2.f32 %v1530_v0 }
 0x7a0   : > { %3032 = vrcp.f32 %v1539_v3 }
 0x7ac   : > { %v3031_v1 = vpop.eup %3030 }
 0x7ad   : > { %v1534_v2 = vsel %vm538_vm3, %v3031_v1, 0.0  ;;  %v3033_v6 = vpop.eup %3032 }
 0x7ae   : > { %1535 = vadd.xlane.f32.xlu0 %v1534_v2  ;;  %v1543_v10 = vmul.f32 %v3033_v6, %v3029_v62 }
 0x7c4   : > { %1620 = vrot.lane.b32.xlu0 %v3366_v38, %s3156_s23 }
 0x7c8   : > { %1779 = vrot.lane.b32.xlu0 %v3349_v24, %s3158_s12 }
 0x837   : > { %v1536_v4 = vpop.xlane.xlu0 %1535 }
 0x838   : > { %3034 = vrcp.f32 %v1536_v4 }
 0x83b   : > { %v1621_v9 = vpop.permute.xlu0 %1620 }
 0x83c   : > { %2863 = vmatpush3.msra.mxu1 %v1621_v9 }
 0x83d   : > { %2865 = vmatmul.mubr.msk.f32.vlgmr.msra.gmra.mxu1 %vm538_vm3, %v1543_v10  ;;  %2872 = vmatprep.subr.mxu1 %v3147_v13 }
 0x83e   : > { %2873 = vmatpush3.xpose.msk.msra.mxu1 %vm538_vm3, %v1782_v12  ;;  %2874 = vmatprep.mubr.msk.f32.mxu1 %vm3148_vm2, %v3147_v13 }
 0x83f   : > { %v1780_v24 = vpop.permute.xlu0 %1779  ;;  %2882 = vmatprep.subr.mxu1 %v3147_v13 }
 0x841   : > { %2875 = vmatmul.mubr.msk.f32.vlgmr.msra.gmra.mxu1 %vm538_vm3, %v1780_v24 }
 0x842   : > { %2884 = vmatprep.mubr.msk.f32.mxu1 %vm3148_vm2, %v3147_v13 }
 0x845   : > { %v3035_v14 = vpop.eup %3034 }
 0x846   : > { %v1542_v15 = vmul.f32 %v3035_v14, %v3031_v1 }
 0x848   : > { %2860 = vmatmul.mubr.msk.f32.vlgmr.msra.gmra.mxu0 %vm538_vm3, %v1542_v15 }
 0x849   : > { %2868 = vmatpush3.msra.mxu0 %v533_v17 }
 0x84a   : > { %2877 = vmatprep.subr.mxu0 %v3147_v13 }
 0x8fd   : > { %v1692_v19 = vpop.f32.mrf.mxu1 }
 0x8ff   : > { %v2866_v20 = vpop.f32.mrf.mxu1 }
 0x901   : > { %v1853_v21 = vpop.f32.mrf.mxu1 }
 0x902   : > { %v1935_v23 = vmul.f32 0.35355338, %v1853_v21 }
 0x903   : > { %v2876_v25 = vpop.f32.mrf.mxu1 }
 0x904   : > { %v1937_v26 = vsel %vm538_vm3, %v1935_v23, -inf  ;;  %v2243_v25 = vld [vmem:[%s3295_s14 + $0x10] sm:$0xff] }
 0x905   : > { %1938 = vmax.xlane.f32.xlu0 %v1937_v26  ;;  %v2242_v26 = vld [vmem:[%s3295_s14 + $0x8] sm:$0xff] }
 0x908   : > { %v1616_v28 = vpop.f32.mrf.mxu0 }
 0x909   : > { %2869 = vmatprep.mubr.msk.f32.mxu0 %vm538_vm3, %v1616_v28  ;;  %v2341_v28 = vld [vmem:[%s3301_s22 + $0x38] sm:$0xff] }
 0x90a   : > { %v2861_v29 = vpop.f32.mrf.mxu0  ;;  %2870 = vmatmul.mubr.msk.f32.vlgmr.msra.gmra.mxu0 %vm538_vm3, %v1692_v19 }
 0x90b   : > { %2878 = vmatpush3.xpose.msk.msra.mxu0 %vm538_vm3, %v1860_v27  ;;  %2879 = vmatprep.mubr.msk.f32.mxu0 %vm3148_vm2, %v3147_v13  ;;  %v2241_v27 = vld [vmem:[%s3295_s14] sm:$0xff]  ;;  %v2340_v29 = vld [vmem:[%s3301_s22 + $0x30] sm:$0xff] }
 0x90c   : > { %2887 = vmatprep.subr.mxu0 %v3147_v13 }
 0x90e   : > { %2880 = vmatmul.mubr.msk.f32.vlgmr.msra.gmra.mxu0 %vm538_vm3, %v1858_v30  ;;  %v2339_v30 = vld [vmem:[%s3301_s22 + $0x28] sm:$0xff] }
 0x90f   : > { %2889 = vmatprep.mubr.msk.f32.mxu0 %vm3148_vm2, %v3147_v13 }
 0x98e   : > { %v1939_v31 = vpop.xlane.xlu0 %1938 }
 0x98f   : > { %v1943_v32 = vsub.f32 %v1935_v23, %v1939_v31  ;;  %v2244_v23 = vld [vmem:[%s3295_s14 + $0x18] sm:$0xff]  ;;  %v2338_v31 = vld [vmem:[%s3301_s22 + $0x20] sm:$0xff] }
 0x991   : > { %v1945_v33 = vmul.f32 1.442695, %v1943_v32 }
 0x993   : > { %3036 = vpow2.f32 %v1945_v33 }
 0x9a0   : > { %v3037_v34 = vpop.eup %3036 }
 0x9a1   : > { %v1949_v35 = vsel %vm538_vm3, %v3037_v34, 0.0 }
 0x9a2   : > { %1950 = vadd.xlane.f32.xlu0 %v1949_v35 }
 0x9ca   : > { %v2871_v39 = vpop.f32.mrf.mxu0 }
 0x9cb   : > { %v1778_v41 = vadd.f32 %v2871_v39, %v1361_v36 }
 0x9cc   : > { %v1768_v42 = vpop.f32.mrf.mxu0 }
 0x9cd   : > { %v1777_v43 = vadd.f32 %v1768_v42, %v1356_v40  ;;  %v2231_v40 = vsub.s32 5, %v3319_v7 }
 0x9ce   : > { %v1931_v44 = vpop.f32.mrf.mxu0 }
 0x9cf   : > { %v1936_v13 = vmul.f32 0.35355338, %v1931_v44  ;;  %v2232_v42 = vrot.slane %v3322_v8, %v2231_v40 }
 0x9d0   : > { %v2881_v46 = vpop.f32.mrf.mxu0 }
 0x9d1   : > { %v1940_v48 = vsel %vm538_vm3, %v1936_v13, -inf }
 0x9d2   : > { %1941 = vmax.xlane.f32.xlu1 %v1940_v48 }
 0x9e3   : > { %1959 = vrot.lane.b32.xlu1 %v3364_v37, %s3159_s30  ;;  %v534_v37 = vld [vmem:[%s3290_s29 + $0x18] sm:$0xff] }
 0xa2b   : > { %v1951_v49 = vpop.xlane.xlu0 %1950 }
 0xa2c   : > { %3038 = vrcp.f32 %v1951_v49 }
 0xa39   : > { %v3039_v50 = vpop.eup %3038 }
 0xa3a   : > { %v1957_v53 = vmul.f32 %v3039_v50, %v3037_v34 }
 0xa5b   : > { %v1942_v45 = vpop.xlane.xlu1 %1941 }
 0xa5c   : > { %v1944_v51 = vsub.f32 %v1936_v13, %v1942_v45 }
 0xa5e   : > { %v1947_v52 = vmul.f32 1.442695, %v1944_v51 }
 0xa5f   : > { %v1960_v47 = vpop.permute.xlu1 %1959 }
 0xa60   : > { %3040 = vpow2.f32 %v1947_v52  ;;  %2883 = vmatpush3.msra.mxu1 %v1960_v47  ;;  %v2337_v52 = vld [vmem:[%s3301_s22 + $0x18] sm:$0xff]  ;;  %v2336_v47 = vld [vmem:[%s3301_s22 + $0x10] sm:$0xff] }
 0xa61   : > { %2885 = vmatmul.mubr.msk.f32.vlgmr.msra.gmra.mxu1 %vm538_vm3, %v1957_v53  ;;  %2892 = vmatprep.subr.mxu1 %v534_v37  ;;  %v2335_v53 = vld [vmem:[%s3301_s22 + $0x8] sm:$0xff] }
 0xa62   : > { %2893 = vmatpush3.msra.mxu1 %v534_v37 }
 0xa63   : > { %2908 = vmatprep.subr.mxu1 %v2341_v28 }
 0xa6d   : > { %v3041_v54 = vpop.eup %3040 }
 0xa6e   : > { %v1952_v55 = vsel %vm538_vm3, %v3041_v54, 0.0 }
 0xa6f   : > { %1953 = vadd.xlane.f32.xlu0 %v1952_v55  ;;  %v2704_v55 = vld [vmem:[%s404_s0] ss:$0 sm:$0xff] }
 0xa85   : > { %2035 = vrot.lane.b32.xlu0 %v3366_v38, %s3159_s30  ;;  %v2196_v38 = vsub.s32 3, %v3319_v7 }
 0xa87   : > { %v2197_v16 = vrot.slane %v3322_v8, %v2196_v38 }
 0xaf8   : > { %v1954_v56 = vpop.xlane.xlu0 %1953 }
 0xaf9   : > { %3042 = vrcp.f32 %v1954_v56 }
 0xafc   : > { %v2036_v57 = vpop.permute.xlu0 %2035 }
 0xafd   : > { %2888 = vmatpush3.msra.mxu0 %v2036_v57 }
 0xafe   : > { %2897 = vmatprep.subr.mxu0 %v2244_v23 }
 0xb06   : > { %v3043_v58 = vpop.eup %3042 }
 0xb07   : > { %v1958_v59 = vmul.f32 %v3043_v58, %v3041_v54  ;;  %v2334_v54 = vld [vmem:[%s3301_s22] sm:$0xff] }
 0xb09   : > { %2890 = vmatmul.mubr.msk.f32.vlgmr.msra.gmra.mxu0 %vm538_vm3, %v1958_v59 }
 0xb0a   : > { %2898 = vmatpush3.msra.mxu0 %v2244_v23 }
 0xb0b   : > { %2899 = vmatprep.subr.mxu0 %v2243_v25 }
 0xb0c   : > { %2900 = vmatpush3.msra.mxu0 %v2243_v25  ;;  %v2458_v25 = vsub.s32 7, %v3319_v7 }
 0xb0d   : > { %2901 = vmatprep.subr.mxu0 %v2242_v26 }
 0xb0e   : > { %2902 = vmatpush3.msra.mxu0 %v2242_v26  ;;  %v2459_v26 = vrot.slane %v3322_v8, %v2458_v25 }
 0xb0f   : > { %2903 = vmatprep.subr.mxu0 %v2241_v27 }
 0xb10   : > { %2904 = vmatpush3.msra.mxu0 %v2241_v27 }
 0xb21   : > { %v2031_v60 = vpop.f32.mrf.mxu1 }
 0xb22   : > { %2894 = vmatprep.mubr.msk.f32.mxu1 %vm538_vm3, %v2031_v60 }
 0xb23   : > { %v2886_v61 = vpop.f32.mrf.mxu1 }
 0xb24   : > { %v2344_v61 = vsub.s32 4, %v3319_v7 }
 0xbc9   : > { %v2107_v18 = vpop.f32.mrf.mxu0 }
 0xbca   : > { %2895 = vmatmul.mubr.msk.f32.vlgmr.msra.gmra.mxu1 %vm538_vm3, %v2107_v18  ;;  %v2345_v18 = vrot.slane %v3322_v8, %v2344_v61 }
 0xbcb   : > { %v2891_v62 = vpop.f32.mrf.mxu0  ;;  %2909 = vmatpush3.msra.mxu1 %v2341_v28 }
 0xbcc   : > { %2910 = vmatprep.subr.mxu1 %v2340_v29 }
 0xbcd   : > { %2911 = vmatpush3.msra.mxu1 %v2340_v29 }
 0xbce   : > { %2912 = vmatprep.subr.mxu1 %v2339_v30 }
 0xbcf   : > { %2913 = vmatpush3.msra.mxu1 %v2339_v30  ;;  %v2709_v30 = vld [vmem:[%s3307_s16 + $0x8] ss:$0 sm:$0xff] }
 0xbd0   : > { %2914 = vmatprep.subr.mxu1 %v2338_v31 }
 0xbd1   : > { %2915 = vmatpush3.msra.mxu1 %v2338_v31 }
 0xbd2   : > { %2916 = vmatprep.subr.mxu1 %v2337_v52 }
 0xbd3   : > { %2917 = vmatpush3.msra.mxu1 %v2337_v52 }
 0xbd4   : > { %2918 = vmatprep.subr.mxu1 %v2336_v47 }
 0xbd5   : > { %2919 = vmatpush3.msra.mxu1 %v2336_v47 }
 0xbd6   : > { %2920 = vmatprep.subr.mxu1 %v2335_v53 }
 0xbd7   : > { %2921 = vmatpush3.msra.mxu1 %v2335_v53 }
 0xbd8   : > { %2922 = vmatprep.subr.mxu1 %v2334_v54 }
 0xbd9   : > { %2923 = vmatpush3.msra.mxu1 %v2334_v54 }
 0xc8a   : > { %v2896_v22 = vpop.f32.mrf.mxu1 }
 0xc8b   : > { %v2193_v63 = vadd.f32 %v2896_v22, %v1778_v41 }
 0xc8c   : > { %v2183_v0 = vpop.f32.mrf.mxu1 }
 0xc8d   : > { %v2199_v1 = vadd.f32 %v2197_v16, %v2193_v63  ;;  %v2192_v2 = vadd.f32 %v2183_v0, %v1777_v43  ;;  %v2237_v43 = vsub.s32 6, %v3319_v7 }
 0xc8f   : > { %v2198_v3 = vadd.f32 %v2197_v16, %v2192_v2  ;;  %v2201_v4 = vadd.f32 %v2199_v1, %v3325_v11  ;;  %v2238_v49 = vrot.slane %v3322_v8, %v2237_v43 }
 0xc91   : > { %v2205_v6 = vsel %vm423_vm1, %v2201_v4, 0.0  ;;  %v2200_v9 = vadd.f32 %v2198_v3, %v3315_v5 }
 0xc92   : > { %2206 = vadd.xlane.f32.xlu0 %v2205_v6 }
 0xc93   : > { %v2202_v10 = vsel %vm423_vm1, %v2200_v9, 0.0 }
 0xc94   : > { %2203 = vadd.xlane.f32.xlu1 %v2202_v10 }
 0xd1b   : > { %v2207_v12 = vpop.xlane.xlu0 %2206 }
 0xd1c   : > { %v2210_v24 = vmul.f32 0.03125, %v2207_v12 }
 0xd1d   : > { %v2204_v14 = vpop.xlane.xlu1 %2203 }
 0xd1e   : > { %v2212_v15 = vsub.f32 %v2201_v4, %v2210_v24  ;;  %v2209_v17 = vmul.f32 0.03125, %v2204_v14 }
 0xd20   : > { %v2211_v19 = vsub.f32 %v2200_v9, %v2209_v17  ;;  %v2214_v20 = vmul.f32 %v2212_v15, %v2212_v15 }
 0xd22   : > { %v2218_v11 = vsel %vm423_vm1, %v2214_v20, 0.0  ;;  %v2213_v21 = vmul.f32 %v2211_v19, %v2211_v19 }
 0xd23   : > { %2219 = vadd.xlane.f32.xlu0 %v2218_v11 }
 0xd24   : > { %v2215_v5 = vsel %vm423_vm1, %v2213_v21, 0.0 }
 0xd25   : > { %2216 = vadd.xlane.f32.xlu1 %v2215_v5 }
 0xdac   : > { %v2220_v32 = vpop.xlane.xlu0 %2219 }
 0xdad   : > { %v2222_v33 = vmul.f32 0.03125, %v2220_v32 }
 0xdae   : > { %v2217_v34 = vpop.xlane.xlu1 %2216 }
 0xdaf   : > { %v2224_v35 = vadd.f32 1e-05, %v2222_v33  ;;  %v2221_v36 = vmul.f32 0.03125, %v2217_v34 }
 0xdb1   : > { %3044 = vrsqrt.f32 %v2224_v35  ;;  %v2223_v39 = vadd.f32 1e-05, %v2221_v36 }
 0xdb3   : > { %3046 = vrsqrt.f32 %v2223_v39 }
 0xdbe   : > { %v3045_v41 = vpop.eup %3044 }
 0xdbf   : > { %v2228_v44 = vmul.f32 %v3045_v41, %v2212_v15 }
 0xdc0   : > { %v3047_v13 = vpop.eup %3046 }
 0xdc1   : > { %v2227_v46 = vmul.f32 %v3047_v13, %v2211_v19  ;;  %v2234_v48 = vmul.f32 %v2232_v42, %v2228_v44 }
 0xdc3   : > { %v2233_v45 = vmul.f32 %v2232_v42, %v2227_v46  ;;  %v2240_v51 = vadd.f32 %v2238_v49, %v2234_v48 }
 0xdc5   : > { %v2239_v50 = vadd.f32 %v2238_v49, %v2233_v45 }
 0xdc7   : > { %2905 = vmatprep.mubr.msk.f32.mxu0 %vm423_vm1, %v2239_v50 }
 0xdc8   : > { %2906 = vmatmul.mubr.msk.f32.vlgmr.msra.gmra.mxu0 %vm423_vm1, %v2240_v51 }
 0xe88   : > { %v2907_v37 = vpop.f32.mrf.mxu0 }
 0xe89   : > { %v2329_v56 = vadd.f32 %v2907_v37, %v2704_v55 }
 0xe8a   : > { %v2323_v57 = vpop.f32.mrf.mxu0 }
 0xe8b   : > { %v2324_v58 = vadd.f32 %v2704_v55, %v2323_v57  ;;  %v2333_v60 = vmax.f32 %v2329_v56, 0.0 }
 0xe8d   : > { %v2332_v59 = vmax.f32 %v2324_v58, 0.0 }
 0xe8f   : > { %2924 = vmatprep.mubr.msk.f32.mxu1 %vm2346_vm4, %v2332_v59 }
 0xe90   : > { %2925 = vmatmul.mubr.msk.f32.vlgmr.msra.gmra.mxu1 %vm2346_vm4, %v2333_v60 }
 0xf50   : > { %v2926_v62 = vpop.f32.mrf.mxu1 }
 0xf51   : > { %v2425_v38 = vadd.f32 %v2926_v62, %v2345_v18 }
 0xf52   : > { %v2419_v16 = vpop.f32.mrf.mxu1 }
 0xf53   : > { %v2420_v22 = vadd.f32 %v2419_v16, %v2345_v18  ;;  %v2429_v63 = vadd.f32 %v2425_v38, %v2240_v51 }
 0xf55   : > { %v2433_v0 = vsel %vm423_vm1, %v2429_v63, 0.0  ;;  %v2428_v1 = vadd.f32 %v2420_v22, %v2239_v50 }
 0xf56   : > { %2434 = vadd.xlane.f32.xlu0 %v2433_v0 }
 0xf57   : > { %v2430_v2 = vsel %vm423_vm1, %v2428_v1, 0.0 }
 0xf58   : > { %2431 = vadd.xlane.f32.xlu1 %v2430_v2 }
 0xfdf   : > { %v2435_v3 = vpop.xlane.xlu0 %2434 }
 0xfe0   : > { %v2437_v4 = vmul.f32 0.03125, %v2435_v3 }
 0xfe1   : > { %v2432_v6 = vpop.xlane.xlu1 %2431 }
 0xfe2   : > { %v2439_v9 = vsub.f32 %v2429_v63, %v2437_v4  ;;  %v2436_v10 = vmul.f32 0.03125, %v2432_v6 }
 0xfe4   : > { %v2438_v12 = vsub.f32 %v2428_v1, %v2436_v10  ;;  %v2441_v24 = vmul.f32 %v2439_v9, %v2439_v9 }
 0xfe6   : > { %v2445_v14 = vsel %vm423_vm1, %v2441_v24, 0.0  ;;  %v2440_v15 = vmul.f32 %v2438_v12, %v2438_v12 }
 0xfe7   : > { %2446 = vadd.xlane.f32.xlu0 %v2445_v14 }
 0xfe8   : > { %v2442_v17 = vsel %vm423_vm1, %v2440_v15, 0.0 }
 0xfe9   : > { %2443 = vadd.xlane.f32.xlu1 %v2442_v17 }
0x1070   : > { %v2447_v19 = vpop.xlane.xlu0 %2446 }
0x1071   : > { %v2449_v20 = vmul.f32 0.03125, %v2447_v19 }
0x1072   : > { %v2444_v11 = vpop.xlane.xlu1 %2443 }
0x1073   : > { %v2451_v21 = vadd.f32 1e-05, %v2449_v20  ;;  %v2448_v5 = vmul.f32 0.03125, %v2444_v11 }
0x1075   : > { %3048 = vrsqrt.f32 %v2451_v21  ;;  %v2450_v23 = vadd.f32 1e-05, %v2448_v5 }
0x1077   : > { %3050 = vrsqrt.f32 %v2450_v23 }
0x1082   : > { %v3049_v27 = vpop.eup %3048 }
0x1083   : > { %v2455_v28 = vmul.f32 %v3049_v27, %v2439_v9 }
0x1084   : > { %v3051_v29 = vpop.eup %3050 }
0x1085   : > { %v2461_v31 = vmul.f32 %v2459_v26, %v2455_v28  ;;  %v2454_v32 = vmul.f32 %v3051_v29, %v2438_v12 }
0x1087   : > { %v2467_v33 = vadd.f32 %v2709_v30, %v2461_v31  ;;  %v2460_v34 = vmul.f32 %v2459_v26, %v2454_v32  ;;  %2473 = sbr.rel (%p2710_p1) target bundleno = 4253 (0x109d), region = 56 }
0x1089   : > { %2469 = vst.msk [vmem:[#allocation2 + $0x8] sm:$0xff] %vm423_vm1, %v2467_v33  ;;  %v2466_v35 = vadd.f32 %v2709_v30, %v2460_v34 }
0x108b   : > { %2468 = vst.msk [vmem:[#allocation2] sm:$0xff] %vm423_vm1, %v2466_v35 }
0x108c   : > { %v2474_v7 = vsel %vm423_vm1, %v2466_v35, 0.0  ;;  %v2481_v8 = vsel %vm423_vm1, %v2467_v33, 0.0  ;;  %vm2493_vm5 = vcmask 1041409   ;;  %vm2496_vm6 = vcmask 254976  }
0x108d   : > { %v2475_v36 = vrot.slane %v2474_v7, 4  ;;  %v2482_v39 = vrot.slane %v2481_v8, 4 }
0x108f   : > { %v2476_v40 = vadd.f32 %v2475_v36, %v2474_v7  ;;  %v2483_v41 = vadd.f32 %v2482_v39, %v2481_v8 }
0x1091   : > { %v2477_v42 = vrot.slane %v2476_v40, 2  ;;  %v2484_v43 = vrot.slane %v2483_v41, 2 }
0x1093   : > { %v2478_v44 = vadd.f32 %v2477_v42, %v2476_v40  ;;  %v2485_v13 = vadd.f32 %v2484_v43, %v2483_v41 }
0x1095   : > { %v2479_v46 = vrot.slane %v2478_v44, 1  ;;  %v2486_v48 = vrot.slane %v2485_v13, 1 }
0x1097   : > { %v2480_v49 = vadd.f32 %v2479_v46, %v2478_v44  ;;  %v2487_v45 = vadd.f32 %v2486_v48, %v2485_v13 }
0x1099   : > { %v2489_v50 = vmul.f32 0.125, %v2480_v49  ;;  %v2490_v51 = vmul.f32 0.125, %v2487_v45 }
0x109b   : > { %v2494_v52 = vsel %vm2493_vm5, %v2490_v51, %v2489_v50 }
0x109c   : > { %2497 = vst.msk [vmem:[%s370_s1] sm:$0x3] %vm2496_vm6, %v2494_v52 }
0x109d PF: > { %s2712_s0 = sshll.u32 %s3132_s28, 5  ;;  %s2512_s16 = sshll.u32 %s370_s1, 4  ;;  %s2513_s16 = int_to_ptr.vmem [resolvable:$true] %s2512_s16 }
0x109e   : > { %s2510_s22 = scalar_lea.hbm %s3584_s7, %s2712_s0  ;;  %s3609_s11 = sand.u32 1, %s3120_s25  }
0x109f   : > { %s2499_s24 = scalar_lea.sflag [#allocation4], %s3609_s11  ;;  %s3052_s26 = scalar_lea.vmem %s2513_s16, 32 }
0x10a0   : > { %p3053_p2 = scmp.ne.s32.totalorder %s2513_s16, %s3052_s26  ;;  %s3160_s8 = smov [#allocation3]  }
0x10a1   : > { %s3056_s17 = sshll.u32 %s3160_s8, 4  ;;  %s3057_s17 = int_to_ptr.vmem [resolvable:$false] %s3056_s17 }
0x10a2   : > { %p3054_p4 = pnand %p3053_p2, %p3250_p3  ;;  %s3058_s18 = scalar_lea.vmem %s3057_s17, 64 }
0x10a3   : > { %p3059_p6 = scmp.lt.s32.totalorder %s2513_s16, %s3057_s17  ;;  %p3060_p7 = scmp.lt.s32.totalorder %s3058_s18, %s3052_s26 }
0x10a4   : > { %p3055_p5 = pneg %p3054_p4 }
0x10a5   : > { %p3061_p8 = por %p3060_p7, %p3059_p6 }
0x10a7   : > { %p3062_p10 = pnand %p3061_p8, %p3055_p5 }
0x10a9   : > { %3065 = shalt.err (!%p3062_p10)
}
0x10aa   : > { %s3066_s28 = scalar_lea.hbm %s2510_s22, 32  ;;  %s3070_s10 = scalar_lea.hbm %s3584_s7, 64 }
0x10ab   : > { %p3067_p11 = scmp.ne.s32.totalorder %s2510_s22, %s3066_s28  ;;  %p3071_p0 = scmp.lt.s32.totalorder %s2510_s22, %s3584_s7 }
0x10ac   : > { %p3072_p1 = scmp.lt.s32.totalorder %s3070_s10, %s3066_s28 }
0x10ad   : > { %p3068_p12 = pnand %p3067_p11, %p3250_p3 }
0x10ae   : > { %p3073_p2 = por %p3072_p1, %p3071_p0 }
0x10af   : > { %p3069_p13 = pneg %p3068_p12 }
0x10b1   : > { %p3074_p4 = pnand %p3073_p2, %p3069_p13 }
0x10b3   : > { %3077 = shalt.err (!%p3074_p4)
}
0x10b4   : > { %2927 = dma.vmem_to_hbm [thread:$0]  (%p3250_p3), %s2513_s16, 32, %s2510_s22, %s2499_s24  }
0x10b5 PF: > { %s3610_s23 = sld [smem:[#allocation10_spill]] }
0x10b6   : > { %s3611_s9 = sld [smem:[#allocation6_spill]] }
0x10bb   : > { %p2933_p5 = scmp.ge.s32.totalorder %s3610_s23, 2 }
0x10bc   : > { %s2524_s30 = sand.u32 1, %s3611_s9  }
0x10bd   : > { %p2930_p6 = pnand %p2933_p5, %p3260_p9  ;;  %s2525_s29 = scalar_lea.sflag [#allocation4], %s2524_s30 }
0x10bf   : > { %p2931_p7 = pneg %p2930_p6 }
0x10c1   : > { %3111 = dma.done.wait (%p2931_p7), %s2525_s29, 32  }
0x10c2   : > { %3113 = vsyncadd (%p2931_p7), %s2525_s29, 4294967264  ;;  %s20_s8 = sadd.s32 1, %s3610_s23   ;;  %s3613_s14 = sld [smem:[#allocation7_spill]] }
0x10c3   : > { %p17_p8 = scmp.ge.s32.totalorder %s20_s8, 6   ;;  %s3614_s26 = sld [smem:[#allocation14_spill]] }
0x10c4   : > { %s3615_s27 = sld [smem:[#allocation8_spill]]  ;;  %s3619_s24 = smov %s3120_s25 }
0x10c5   : > { %s3616_s28 = sld [smem:[#allocation9_spill]]  ;;  %19 = sbr.rel (!%p17_p8) target bundleno = 8 (0x8), region = 109 }
0x10c6   : > { %s3617_s29 = sld [smem:[#allocation11_spill]] }
0x10c7   : > { %s3618_s30 = sld [smem:[#allocation12_spill]] }
0x10c8   : > { %s3620_s25 = smov %s3613_s14 }
0x10ca   :  { %2530 = vsyncpa [#allocation4], 1 }
0x10cb   :  { %2532 = vsyncpa [#allocation4 + $0x1], 1 }

</bundles_post_ra>
